<compile_context>
chip_gen: v7x
topology: tpu7x:2x2x1
jax: 0.10.0
libtpu: 0.0.40
codegen_flags: <defaults>
</compile_context>

<pallas_src>
import math
import functools

import jax
import jax.numpy as jnp
from jax import lax
from jax.experimental import pallas as pl
from jax.experimental.pallas import tpu as pltpu


def _bottle2neck_kernel(
    # inputs
    x_ref,                                   # (Cin, Wb)            op_dtype
    w1_ref, bst1_ref,                        # (Cmid,Cin) op ; (Cmid,3)=[b1,s1,t1] f32
    cw_ref, cbst_ref,                        # (nums,width,K*width) op ; (nums,width,3)=[cb,cs,ct] f32
    w3_ref, bst3_ref,                        # (planes,Cmid) op ; (planes,4)=[b3,s3,t3,sb2] f32
    sw1_ref, sb1_ref, sw2_ref,               # SE fc1 (bneck,planes),(bneck,1); fc2 (planes,bneck) f32
    # outputs
    o_ref,                                   # (planes, Wb)         out_dtype
    # scratch
    mid_ref,                                 # VMEM (Cmid, Wb)      scratch_dtype
    taps_ref,                                # VMEM (K*width, Wb)   scratch_dtype
    *, width, nums, ksize, dilation, pad, seq_len, seg_len, n_seg, approx_recip):
    sc_dtype = mid_ref.dtype
    Wb = x_ref.shape[-1]                     # = n_seg * seg_len

    # ---- conv1 (1x1) -> ReLU -> BN1 (folded), straight into the shared mid scratch ----
    bst1 = bst1_ref[...]
    h = jnp.dot(w1_ref[...], x_ref[...], preferred_element_type=jnp.float32) + bst1[:, 0:1]
    h = jnp.maximum(h, 0.0)
    mid_ref[...] = (h * bst1[:, 1:2] + bst1[:, 2:3]).astype(sc_dtype)

    # Per-segment column index / validity mask, hoisted once (a "segment" is one batch
    # element's seg_len-long lane range inside this block).
    col_seg = lax.broadcasted_iota(jnp.int32, (1, seg_len), 1)        # (1, Tp)
    col_all = col_seg if n_seg == 1 else jnp.tile(col_seg, (1, n_seg))
    valid = col_all < seq_len                                         # (1, Wb)

    # ---- hierarchical Res2Net branches ----
    # Each dilated conv = K lane-rolls of the (already boundary-zeroed) input written
    # into the taps scratch, fused into ONE matmul with a (K*width)-deep contraction.
    # seg_len >= seq_len + pad guarantees every roll only wraps zeros into the valid
    # region (including across segment boundaries) -> no per-tap masks are needed.
    sp = None                                                         # running value, f32
    for i in range(nums):
        chunk = mid_ref[i * width:(i + 1) * width, :].astype(jnp.float32)
        sp = chunk if i == 0 else sp + chunk
        sp_op = jnp.where(valid, sp, 0.0).astype(sc_dtype)            # mask ONCE, cast ONCE
        for j in range(ksize):
            shift = (pad - j * dilation) % Wb
            taps_ref[j * width:(j + 1) * width, :] = (
                sp_op if shift == 0 else pltpu.roll(sp_op, shift=shift, axis=1))
        cbst = cbst_ref[i]                                            # (width, 3)
        y = jnp.dot(cw_ref[i], taps_ref[...],
                    preferred_element_type=jnp.float32) + cbst[:, 0:1]
        y = jnp.maximum(y, 0.0)                                       # ReLU
        sp = y * cbst[:, 1:2] + cbst[:, 2:3]                          # BN_i (folded), f32
        mid_ref[i * width:(i + 1) * width, :] = sp.astype(sc_dtype)
    # Last split: rows [nums*width, Cmid) still hold the conv1 output -> no copy.

    # ---- conv3 (1x1) -> ReLU -> BN3 ----
    bst3 = bst3_ref[...]
    z = jnp.dot(w3_ref[...], mid_ref[...],
                preferred_element_type=jnp.float32) + bst3[:, 0:1]
    z = jnp.maximum(z, 0.0)
    z = z * bst3[:, 1:2] + bst3[:, 2:3]                               # (planes, Wb) f32

    # ---- SE: per-segment masked global mean -> 1x1 -> ReLU -> 1x1 -> sigmoid ----
    mask_T = col_seg < seq_len                                        # (1, Tp)
    inv_len = 1.0 / seq_len
    means = []
    for s in range(n_seg):
        zs = z[:, s * seg_len:(s + 1) * seg_len]
        means.append(jnp.sum(jnp.where(mask_T, zs, 0.0), axis=-1, keepdims=True) * inv_len)
    m = means[0] if n_seg == 1 else jnp.concatenate(means, axis=1)    # (planes, n_seg)

    u = jnp.dot(sw1_ref[...], m, preferred_element_type=jnp.float32) + sb1_ref[...]
    u = jnp.maximum(u, 0.0)
    v = jnp.dot(sw2_ref[...], u, preferred_element_type=jnp.float32) + bst3[:, 3:4]
    ev = jnp.exp(-v)                                                  # EUP
    if approx_recip:
        g = pl.reciprocal(1.0 + ev, approx=True)                      # sigmoid gate via EUP vrcp
    else:
        g = 1.0 / (1.0 + ev)                                          # exact (f32 path)

    # ---- gate + residual, per segment (f32 math, cast only at the store) ----
    for s in range(n_seg):
        lo, hi = s * seg_len, (s + 1) * seg_len
        o_ref[:, lo:hi] = (z[:, lo:hi] * g[:, s:s + 1]
                           + x_ref[:, lo:hi].astype(jnp.float32)).astype(o_ref.dtype)


def bottle2neck_forward(x, params, *, width, nums, ksize, dilation,
                        use_bf16=True, out_dtype=None, batch_tile=None):
    B, Cin, T = x.shape
    pad = (ksize // 2) * dilation
    Cmid = width * (nums + 1)
    planes = params["w3"].shape[0]
    bneck = params["sw1"].shape[0]
    out_dtype = jnp.float32 if out_dtype is None else jnp.dtype(out_dtype)

    assert Cin == planes, "residual add requires inplanes == planes"
    assert width % 8 == 0, "width must be a multiple of 8 for tile-aligned branch slabs"

    op_dtype = jnp.bfloat16 if use_bf16 else jnp.float32
    # bf16 scratch sub-slab writes need 16-sublane alignment; else fall back to f32 scratch.
    scratch_dtype = op_dtype if (not use_bf16 or width % 16 == 0) else jnp.float32

    # Lane-dense block length, wide enough (>= T + pad) that lane-rolls only wrap zeros
    # back into the valid region (see kernel).
    Tp = ((T + pad + 127) // 128) * 128

    it_op = jnp.dtype(op_dtype).itemsize
    it_sc = jnp.dtype(scratch_dtype).itemsize
    it_out = jnp.dtype(out_dtype).itemsize

    # ---- per-generation VMEM budget & batch-tile selection ----
    try:
        vmem_cap = int(pltpu.get_tpu_info().vmem_capacity_bytes)
    except Exception:                        # conservative fallback (v7x-sized)
        vmem_cap = 64 * 1024 * 1024
    headroom = max(8 << 20, vmem_cap // 8)   # leave Mosaic internal/spill scratch room
    budget = vmem_cap - headroom

    def ceil128(n):
        return ((int(n) + 127) // 128) * 128

    def vmem_for(bt):
        wb = bt * Tp
        weights = (Cmid * ceil128(Cin) * it_op
                   + nums * width * ceil128(ksize * width) * it_op
                   + planes * ceil128(Cmid) * it_op
                   + bneck * ceil128(planes) * 4 + planes * ceil128(bneck) * 4
                   + (Cmid + nums * width + planes + bneck) * 128 * 4)  # packed (C,k) vecs (lane-padded)
        per = (2 * Cin * wb * it_op             # x block (double-buffered)
               + 2 * planes * wb * it_out       # out block (double-buffered)
               + Cmid * wb * it_sc              # mid scratch
               + ksize * width * wb * it_sc     # taps scratch
               + 3 * planes * wb * 4            # z / h / gated-output temporaries (f32)
               + ksize * width * wb * 4)        # sp / rolled-tap temporaries (f32)
        return 2 * weights + per                # weights double-buffered by the pipeliner

    if batch_tile is None:
        bt = 1
        for cand in (2, 4, 8, 16):
            if cand <= B and vmem_for(cand) <= budget:
                bt = cand
        while bt > 1 and (B + bt - 1) // bt < 2:    # keep >= 2 grid steps (v7x: 2 TensorCores)
            bt //= 2
    else:
        bt = int(batch_tile)

    Bp = ((B + bt - 1) // bt) * bt
    Wb = bt * Tp
    vmem_limit = int(min(budget, max(vmem_for(bt) + (8 << 20), 32 << 20)))

    # ---- data / parameter packing ----
    xp = jnp.pad(x, ((0, Bp - B), (0, 0), (0, Tp - T)))
    x2 = jnp.transpose(xp, (1, 0, 2)).reshape(Cin, Bp * Tp).astype(op_dtype)

    # Fuse the K dilated taps of each branch conv into one (width, K*width) matrix
    # (matching the tap-stacking order used in the kernel).
    cw_flat = jnp.transpose(params["cw"], (0, 1, 3, 2)).reshape(nums, width, ksize * width)

    w1 = params["w1"].astype(op_dtype)
    cw = cw_flat.astype(op_dtype)
    w3 = params["w3"].astype(op_dtype)
    bst1 = jnp.concatenate([params["b1"], params["s1"], params["t1"]], axis=1)                 # (Cmid, 3)
    cbst = jnp.concatenate([params["cb"], params["cs"], params["ct"]], axis=2)                 # (nums, width, 3)
    bst3 = jnp.concatenate([params["b3"], params["s3"], params["t3"], params["sb2"]], axis=1)  # (planes, 4)
    plist = [w1, bst1, cw, cbst, w3, bst3, params["sw1"], params["sb1"], params["sw2"]]

    kern = functools.partial(
        _bottle2neck_kernel,
        width=width, nums=nums, ksize=ksize, dilation=dilation, pad=pad,
        seq_len=T, seg_len=Tp, n_seg=bt, approx_recip=use_bf16)

    def full_spec(a):
        return pl.BlockSpec(a.shape, lambda g, _n=a.ndim: (0,) * _n)

    in_specs = [pl.BlockSpec((Cin, Wb), lambda g: (0, g))] + [full_spec(p) for p in plist]
    out_spec = pl.BlockSpec((planes, Wb), lambda g: (0, g))

    # Advisory cost estimate for XLA scheduling around the custom call.
    flops = int(2 * Bp * Tp * (Cmid * Cin + nums * ksize * width * width + planes * Cmid)
                + 4 * Bp * bneck * planes)
    bytes_acc = int(x2.size * x2.dtype.itemsize + planes * Bp * Tp * it_out
                    + sum(int(p.size * p.dtype.itemsize) for p in plist))
    cost = pl.CostEstimate(flops=flops, transcendentals=int(Bp * (planes + bneck)),
                           bytes_accessed=bytes_acc)

    out = pl.pallas_call(
        kern,
        out_shape=jax.ShapeDtypeStruct((planes, Bp * Tp), out_dtype),
        grid_spec=pltpu.PrefetchScalarGridSpec(
            num_scalar_prefetch=0,
            grid=(Bp // bt,),
            in_specs=in_specs,
            out_specs=out_spec,
            scratch_shapes=[pltpu.VMEM((Cmid, Wb), scratch_dtype),
                            pltpu.VMEM((ksize * width, Wb), scratch_dtype)]),
        compiler_params=pltpu.CompilerParams(
            dimension_semantics=("parallel",),
            vmem_limit_bytes=vmem_limit),
        cost_estimate=cost,
    )(x2, *plist)

    return jnp.transpose(out.reshape(planes, Bp, Tp), (1, 0, 2))[:B, :, :T]


def bottle2neck_ref(x, params, *, width, nums, ksize, dilation):
    """Pure-JAX f32 reference (same math as the PyTorch module, batched)."""
    pad = (ksize // 2) * dilation
    T = x.shape[-1]
    hi = jax.lax.Precision.HIGHEST
    h = jnp.einsum("oc,bct->bot", params["w1"], x, precision=hi) + params["b1"][None]
    h = jnp.maximum(h, 0.0)
    h = h * params["s1"][None] + params["t1"][None]
    outs = []
    sp = None
    for i in range(nums):
        chunk = h[:, i * width:(i + 1) * width, :]
        sp = chunk if i == 0 else sp + chunk
        spp = jnp.pad(sp, ((0, 0), (0, 0), (pad, pad)))
        y = jnp.zeros_like(chunk) + params["cb"][i][None]
        for j in range(ksize):
            y = y + jnp.einsum("oc,bct->bot", params["cw"][i, :, :, j],
                               spp[:, :, j * dilation:j * dilation + T], precision=hi)
        y = jnp.maximum(y, 0.0)
        sp = y * params["cs"][i][None] + params["ct"][i][None]
        outs.append(sp)
    outs.append(h[:, nums * width:(nums + 1) * width, :])
    mid = jnp.concatenate(outs, axis=1)
    z = jnp.einsum("oc,bct->bot", params["w3"], mid, precision=hi) + params["b3"][None]
    z = jnp.maximum(z, 0.0)
    z = z * params["s3"][None] + params["t3"][None]
    m = jnp.mean(z, axis=-1, keepdims=True)
    u = jnp.maximum(jnp.einsum("oc,bcl->bol", params["sw1"], m, precision=hi) + params["sb1"][None], 0.0)
    v = jnp.einsum("oc,bcl->bol", params["sw2"], u, precision=hi) + params["sb2"][None]
    return z * jax.nn.sigmoid(v) + x


def make_params(key, *, inplanes, planes, scale, ksize, se_bottleneck=128):
    width = int(math.floor(planes / scale))
    nums = scale - 1
    Cmid = width * scale
    ks = jax.random.split(key, 24)

    def nrm(k, shape, s=0.1):
        return s * jax.random.normal(k, shape, dtype=jnp.float32)

    def bn_fold(kg, kb, km, kv, shape):
        gamma = 1.0 + nrm(kg, shape)
        beta = nrm(kb, shape)
        mean = nrm(km, shape)
        var = 1.0 + 0.1 * jnp.abs(jax.random.normal(kv, shape, dtype=jnp.float32))
        s = gamma / jnp.sqrt(var + 1e-5)
        t = beta - mean * s
        return s[..., None], t[..., None]

    p = {}
    p["w1"] = nrm(ks[0], (Cmid, inplanes))
    p["b1"] = nrm(ks[1], (Cmid,))[:, None]
    p["s1"], p["t1"] = bn_fold(ks[2], ks[3], ks[4], ks[5], (Cmid,))
    p["cw"] = nrm(ks[6], (nums, width, width, ksize))
    p["cb"] = nrm(ks[7], (nums, width))[..., None]
    p["cs"], p["ct"] = bn_fold(ks[8], ks[9], ks[10], ks[11], (nums, width))
    p["w3"] = nrm(ks[12], (planes, Cmid))
    p["b3"] = nrm(ks[13], (planes,))[:, None]
    p["s3"], p["t3"] = bn_fold(ks[14], ks[15], ks[16], ks[17], (planes,))
    p["sw1"] = nrm(ks[18], (se_bottleneck, planes))
    p["sb1"] = nrm(ks[19], (se_bottleneck,))[:, None]
    p["sw2"] = nrm(ks[20], (planes, se_bottleneck))
    p["sb2"] = nrm(ks[21], (planes,))[:, None]
    return p, width, nums


if __name__ == "__main__":
    # Small shapes consistent with the module (residual requires inplanes == planes;
    # width = planes/scale must be a multiple of 8; 16 keeps the bf16 scratch tile-aligned).
    B, inplanes, planes, T = 2, 64, 64, 24
    scale, ksize, dilation = 4, 3, 2

    key = jax.random.PRNGKey(0)
    k_x, k_p, k_x4 = jax.random.split(key, 3)
    params, width, nums = make_params(k_p, inplanes=inplanes, planes=planes,
                                      scale=scale, ksize=ksize)
    x = jax.random.normal(k_x, (B, inplanes, T), dtype=jnp.float32)

    ref = jax.block_until_ready(
        bottle2neck_ref(x, params, width=width, nums=nums, ksize=ksize, dilation=dilation))

    # f32 matmul-operand path (tight check).
    out32 = jax.block_until_ready(
        bottle2neck_forward(x, params, width=width, nums=nums,
                            ksize=ksize, dilation=dilation, use_bf16=False))
    assert out32.shape == (B, planes, T)
    assert bool(jnp.all(jnp.isfinite(out32)))
    err32 = float(jnp.max(jnp.abs(out32 - ref)))
    assert err32 < 2e-2, f"f32 max abs error too large: {err32}"

    # bf16 matmul-operand path (bf16 mid/taps scratch, f32 accumulation; looser check).
    out16 = jax.block_until_ready(
        bottle2neck_forward(x, params, width=width, nums=nums,
                            ksize=ksize, dilation=dilation, use_bf16=True))
    assert out16.shape == (B, planes, T)
    assert bool(jnp.all(jnp.isfinite(out16)))
    err16 = float(jnp.max(jnp.abs(out16 - ref)))
    assert err16 < 2.5e-1, f"bf16 max abs error too large: {err16}"

    # bf16 output path (halves output HBM/VMEM traffic; math stays f32 in-kernel).
    out16b = jax.block_until_ready(
        bottle2neck_forward(x, params, width=width, nums=nums,
                            ksize=ksize, dilation=dilation, use_bf16=True,
                            out_dtype=jnp.bfloat16))
    assert out16b.dtype == jnp.bfloat16 and out16b.shape == (B, planes, T)
    errb = float(jnp.max(jnp.abs(out16b.astype(jnp.float32) - ref)))
    assert errb < 3e-1, f"bf16-output max abs error too large: {errb}"

    # Multi-batch block (Bt=2 batch elements per grid step), exact f32 path.
    x4 = jax.random.normal(k_x4, (4, inplanes, T), dtype=jnp.float32)
    ref4 = bottle2neck_ref(x4, params, width=width, nums=nums, ksize=ksize, dilation=dilation)
    out4 = jax.block_until_ready(
        bottle2neck_forward(x4, params, width=width, nums=nums,
                            ksize=ksize, dilation=dilation, use_bf16=False, batch_tile=2))
    assert out4.shape == (4, planes, T)
    err4 = float(jnp.max(jnp.abs(out4 - ref4)))
    assert err4 < 2e-2, f"multi-batch f32 max abs error too large: {err4}"

    print("KERNEL_OK")
</pallas_src>

<mosaic_0001>
module attributes {stable_mosaic.version = 11 : i64} {
  func.func @_bottle2neck_kernel(%arg0: i32, %arg1: memref<64x128xf32, #tpu.memory_space<vmem>>, %arg2: memref<64x64xf32, #tpu.memory_space<vmem>>, %arg3: memref<64x3xf32, #tpu.memory_space<vmem>>, %arg4: memref<3x16x48xf32, #tpu.memory_space<vmem>>, %arg5: memref<3x16x3xf32, #tpu.memory_space<vmem>>, %arg6: memref<64x64xf32, #tpu.memory_space<vmem>>, %arg7: memref<64x4xf32, #tpu.memory_space<vmem>>, %arg8: memref<128x64xf32, #tpu.memory_space<vmem>>, %arg9: memref<128x1xf32, #tpu.memory_space<vmem>>, %arg10: memref<64x128xf32, #tpu.memory_space<vmem>>, %arg11: memref<64x128xf32, #tpu.memory_space<vmem>>, %arg12: memref<64x128xf32, #tpu.memory_space<vmem>>, %arg13: memref<48x128xf32, #tpu.memory_space<vmem>>) attributes {dimension_semantics = [#tpu.dimension_semantics<parallel>], iteration_bounds = array<i64: 2>, scalar_prefetch = 0 : i64, scratch_operands = 2 : i64, tpu.core_type = #tpu.core_type<tc>, window_params = [{transform_indices = @transform_0, window_bounds = array<i64: 64, 128>}, {pipeline_mode = #tpu.pipeline_mode<synchronous>, transform_indices = @transform_1, window_bounds = array<i64: 64, 64>}, {pipeline_mode = #tpu.pipeline_mode<synchronous>, transform_indices = @transform_2, window_bounds = array<i64: 64, 3>}, {pipeline_mode = #tpu.pipeline_mode<synchronous>, transform_indices = @transform_3, window_bounds = array<i64: 3, 16, 48>}, {pipeline_mode = #tpu.pipeline_mode<synchronous>, transform_indices = @transform_4, window_bounds = array<i64: 3, 16, 3>}, {pipeline_mode = #tpu.pipeline_mode<synchronous>, transform_indices = @transform_5, window_bounds = array<i64: 64, 64>}, {pipeline_mode = #tpu.pipeline_mode<synchronous>, transform_indices = @transform_6, window_bounds = array<i64: 64, 4>}, {pipeline_mode = #tpu.pipeline_mode<synchronous>, transform_indices = @transform_7, window_bounds = array<i64: 128, 64>}, {pipeline_mode = #tpu.pipeline_mode<synchronous>, transform_indices = @transform_8, window_bounds = array<i64: 128, 1>}, {pipeline_mode = #tpu.pipeline_mode<synchronous>, transform_indices = @transform_9, window_bounds = array<i64: 64, 128>}, {transform_indices = @transform_10, window_bounds = array<i64: 64, 128>}]} {
    %c0 = arith.constant 0 : index
    %c0_0 = arith.constant 0 : index
    %0 = vector.load %arg3[%c0, %c0_0] : memref<64x3xf32, #tpu.memory_space<vmem>>, vector<64x3xf32>
    %c0_1 = arith.constant 0 : index
    %c0_2 = arith.constant 0 : index
    %1 = vector.load %arg2[%c0_1, %c0_2] : memref<64x64xf32, #tpu.memory_space<vmem>>, vector<64x64xf32>
    %c0_3 = arith.constant 0 : index
    %c0_4 = arith.constant 0 : index
    %2 = vector.load %arg1[%c0_3, %c0_4] : memref<64x128xf32, #tpu.memory_space<vmem>>, vector<64x128xf32>
    %cst = arith.constant dense<0.000000e+00> : vector<64x128xf32>
    %3 = tpu.matmul %1, %2, %cst {dimension_numbers = #tpu.dot_dimension_numbers<[1], [0], [0], [1], [0, 0, 1, 1], [], []>} : vector<64x64xf32>, vector<64x128xf32>, vector<64x128xf32> -> vector<64x128xf32>
    %4 = vector.extract_strided_slice %0 {offsets = [0, 0], sizes = [64, 1], strides = [1, 1]} : vector<64x3xf32> to vector<64x1xf32>
    %5 = vector.broadcast %4 : vector<64x1xf32> to vector<64x128xf32>
    %6 = arith.addf %3, %5 : vector<64x128xf32>
    %cst_5 = arith.constant 0.000000e+00 : f32
    %7 = vector.broadcast %cst_5 : f32 to vector<64x128xf32>
    %8 = arith.maximumf %6, %7 : vector<64x128xf32>
    %9 = vector.extract_strided_slice %0 {offsets = [0, 1], sizes = [64, 1], strides = [1, 1]} : vector<64x3xf32> to vector<64x1xf32>
    %10 = vector.broadcast %9 : vector<64x1xf32> to vector<64x128xf32>
    %11 = arith.mulf %8, %10 : vector<64x128xf32>
    %12 = vector.extract_strided_slice %0 {offsets = [0, 2], sizes = [64, 1], strides = [1, 1]} : vector<64x3xf32> to vector<64x1xf32>
    %13 = vector.broadcast %12 : vector<64x1xf32> to vector<64x128xf32>
    %14 = arith.addf %11, %13 : vector<64x128xf32>
    %c0_6 = arith.constant 0 : index
    %c0_7 = arith.constant 0 : index
    %15 = vector.load %arg12[%c0_6, %c0_7] : memref<64x128xf32, #tpu.memory_space<vmem>>, vector<64x128xf32>
    tpu.vector_store %arg12[%c0_6, %c0_7], %14 {strides = array<i32>} : memref<64x128xf32, #tpu.memory_space<vmem>>, vector<64x128xf32>,
    %16 = tpu.iota {dimensions = array<i32: 1>} : vector<1x128xi32>
    %c24_i32 = arith.constant 24 : i32
    %17 = vector.broadcast %c24_i32 : i32 to vector<1x128xi32>
    %18 = arith.cmpi slt, %16, %17 : vector<1x128xi32>
    %c0_8 = arith.constant 0 : index
    %c0_9 = arith.constant 0 : index
    %19 = vector.load %arg12[%c0_8, %c0_9] : memref<64x128xf32, #tpu.memory_space<vmem>>, vector<16x128xf32>
    %cst_10 = arith.constant 0.000000e+00 : f32
    %20 = vector.shape_cast %18 : vector<1x128xi1> to vector<1x128xi1>
    %21 = vector.broadcast %20 : vector<1x128xi1> to vector<16x128xi1>
    %22 = vector.broadcast %cst_10 : f32 to vector<16x128xf32>
    %23 = arith.select %21, %19, %22 : vector<16x128xi1>, vector<16x128xf32>
    %c2_i32 = arith.constant 2 : i32
    %24 = tpu.dynamic_rotate %23 by %c2_i32 dim 1 : vector<16x128xf32>, i32 -> vector<16x128xf32>
    %c0_11 = arith.constant 0 : index
    %c0_12 = arith.constant 0 : index
    %25 = vector.load %arg13[%c0_11, %c0_12] : memref<48x128xf32, #tpu.memory_space<vmem>>, vector<16x128xf32>
    tpu.vector_store %arg13[%c0_11, %c0_12], %24 {strides = array<i32>} : memref<48x128xf32, #tpu.memory_space<vmem>>, vector<16x128xf32>,
    %c16 = arith.constant 16 : index
    %c0_13 = arith.constant 0 : index
    %26 = vector.load %arg13[%c16, %c0_13] : memref<48x128xf32, #tpu.memory_space<vmem>>, vector<16x128xf32>
    tpu.vector_store %arg13[%c16, %c0_13], %23 {strides = array<i32>} : memref<48x128xf32, #tpu.memory_space<vmem>>, vector<16x128xf32>,
    %c126_i32 = arith.constant 126 : i32
    %27 = tpu.dynamic_rotate %23 by %c126_i32 dim 1 : vector<16x128xf32>, i32 -> vector<16x128xf32>
    %c32 = arith.constant 32 : index
    %c0_14 = arith.constant 0 : index
    %28 = vector.load %arg13[%c32, %c0_14] : memref<48x128xf32, #tpu.memory_space<vmem>>, vector<16x128xf32>
    tpu.vector_store %arg13[%c32, %c0_14], %27 {strides = array<i32>} : memref<48x128xf32, #tpu.memory_space<vmem>>, vector<16x128xf32>,
    %c0_15 = arith.constant 0 : index
    %c0_16 = arith.constant 0 : index
    %c0_17 = arith.constant 0 : index
    %29 = vector.load %arg5[%c0_15, %c0_16, %c0_17] : memref<3x16x3xf32, #tpu.memory_space<vmem>>, vector<1x16x3xf32>
    %30 = vector.shape_cast %29 : vector<1x16x3xf32> to vector<16x3xf32>
    %c0_18 = arith.constant 0 : index
    %c0_19 = arith.constant 0 : index
    %c0_20 = arith.constant 0 : index
    %31 = vector.load %arg4[%c0_18, %c0_19, %c0_20] : memref<3x16x48xf32, #tpu.memory_space<vmem>>, vector<1x16x48xf32>
    %32 = vector.shape_cast %31 : vector<1x16x48xf32> to vector<16x48xf32>
    %c0_21 = arith.constant 0 : index
    %c0_22 = arith.constant 0 : index
    %33 = vector.load %arg13[%c0_21, %c0_22] : memref<48x128xf32, #tpu.memory_space<vmem>>, vector<48x128xf32>
    %cst_23 = arith.constant dense<0.000000e+00> : vector<16x128xf32>
    %34 = tpu.matmul %32, %33, %cst_23 {dimension_numbers = #tpu.dot_dimension_numbers<[1], [0], [0], [1], [0, 0, 1, 1], [], []>} : vector<16x48xf32>, vector<48x128xf32>, vector<16x128xf32> -> vector<16x128xf32>
    %35 = vector.extract_strided_slice %30 {offsets = [0, 0], sizes = [16, 1], strides = [1, 1]} : vector<16x3xf32> to vector<16x1xf32>
    %36 = vector.broadcast %35 : vector<16x1xf32> to vector<16x128xf32>
    %37 = arith.addf %34, %36 : vector<16x128xf32>
    %cst_24 = arith.constant 0.000000e+00 : f32
    %38 = vector.broadcast %cst_24 : f32 to vector<16x128xf32>
    %39 = arith.maximumf %37, %38 : vector<16x128xf32>
    %40 = vector.extract_strided_slice %30 {offsets = [0, 1], sizes = [16, 1], strides = [1, 1]} : vector<16x3xf32> to vector<16x1xf32>
    %41 = vector.broadcast %40 : vector<16x1xf32> to vector<16x128xf32>
    %42 = arith.mulf %39, %41 : vector<16x128xf32>
    %43 = vector.extract_strided_slice %30 {offsets = [0, 2], sizes = [16, 1], strides = [1, 1]} : vector<16x3xf32> to vector<16x1xf32>
    %44 = vector.broadcast %43 : vector<16x1xf32> to vector<16x128xf32>
    %45 = arith.addf %42, %44 : vector<16x128xf32>
    %c0_25 = arith.constant 0 : index
    %c0_26 = arith.constant 0 : index
    %46 = vector.load %arg12[%c0_25, %c0_26] : memref<64x128xf32, #tpu.memory_space<vmem>>, vector<16x128xf32>
    tpu.vector_store %arg12[%c0_25, %c0_26], %45 {strides = array<i32>} : memref<64x128xf32, #tpu.memory_space<vmem>>, vector<16x128xf32>,
    %c16_27 = arith.constant 16 : index
    %c0_28 = arith.constant 0 : index
    %47 = vector.load %arg12[%c16_27, %c0_28] : memref<64x128xf32, #tpu.memory_space<vmem>>, vector<16x128xf32>
    %48 = arith.addf %45, %47 : vector<16x128xf32>
    %cst_29 = arith.constant 0.000000e+00 : f32
    %49 = vector.shape_cast %18 : vector<1x128xi1> to vector<1x128xi1>
    %50 = vector.broadcast %49 : vector<1x128xi1> to vector<16x128xi1>
    %51 = vector.broadcast %cst_29 : f32 to vector<16x128xf32>
    %52 = arith.select %50, %48, %51 : vector<16x128xi1>, vector<16x128xf32>
    %c2_i32_30 = arith.constant 2 : i32
    %53 = tpu.dynamic_rotate %52 by %c2_i32_30 dim 1 : vector<16x128xf32>, i32 -> vector<16x128xf32>
    %c0_31 = arith.constant 0 : index
    %c0_32 = arith.constant 0 : index
    %54 = vector.load %arg13[%c0_31, %c0_32] : memref<48x128xf32, #tpu.memory_space<vmem>>, vector<16x128xf32>
    tpu.vector_store %arg13[%c0_31, %c0_32], %53 {strides = array<i32>} : memref<48x128xf32, #tpu.memory_space<vmem>>, vector<16x128xf32>,
    %c16_33 = arith.constant 16 : index
    %c0_34 = arith.constant 0 : index
    %55 = vector.load %arg13[%c16_33, %c0_34] : memref<48x128xf32, #tpu.memory_space<vmem>>, vector<16x128xf32>
    tpu.vector_store %arg13[%c16_33, %c0_34], %52 {strides = array<i32>} : memref<48x128xf32, #tpu.memory_space<vmem>>, vector<16x128xf32>,
    %c126_i32_35 = arith.constant 126 : i32
    %56 = tpu.dynamic_rotate %52 by %c126_i32_35 dim 1 : vector<16x128xf32>, i32 -> vector<16x128xf32>
    %c32_36 = arith.constant 32 : index
    %c0_37 = arith.constant 0 : index
    %57 = vector.load %arg13[%c32_36, %c0_37] : memref<48x128xf32, #tpu.memory_space<vmem>>, vector<16x128xf32>
    tpu.vector_store %arg13[%c32_36, %c0_37], %56 {strides = array<i32>} : memref<48x128xf32, #tpu.memory_space<vmem>>, vector<16x128xf32>,
    %c1 = arith.constant 1 : index
    %c0_38 = arith.constant 0 : index
    %c0_39 = arith.constant 0 : index
    %58 = vector.load %arg5[%c1, %c0_38, %c0_39] : memref<3x16x3xf32, #tpu.memory_space<vmem>>, vector<1x16x3xf32>
    %59 = vector.shape_cast %58 : vector<1x16x3xf32> to vector<16x3xf32>
    %c1_40 = arith.constant 1 : index
    %c0_41 = arith.constant 0 : index
    %c0_42 = arith.constant 0 : index
    %60 = vector.load %arg4[%c1_40, %c0_41, %c0_42] : memref<3x16x48xf32, #tpu.memory_space<vmem>>, vector<1x16x48xf32>
    %61 = vector.shape_cast %60 : vector<1x16x48xf32> to vector<16x48xf32>
    %c0_43 = arith.constant 0 : index
    %c0_44 = arith.constant 0 : index
    %62 = vector.load %arg13[%c0_43, %c0_44] : memref<48x128xf32, #tpu.memory_space<vmem>>, vector<48x128xf32>
    %cst_45 = arith.constant dense<0.000000e+00> : vector<16x128xf32>
    %63 = tpu.matmul %61, %62, %cst_45 {dimension_numbers = #tpu.dot_dimension_numbers<[1], [0], [0], [1], [0, 0, 1, 1], [], []>} : vector<16x48xf32>, vector<48x128xf32>, vector<16x128xf32> -> vector<16x128xf32>
    %64 = vector.extract_strided_slice %59 {offsets = [0, 0], sizes = [16, 1], strides = [1, 1]} : vector<16x3xf32> to vector<16x1xf32>
    %65 = vector.broadcast %64 : vector<16x1xf32> to vector<16x128xf32>
    %66 = arith.addf %63, %65 : vector<16x128xf32>
    %cst_46 = arith.constant 0.000000e+00 : f32
    %67 = vector.broadcast %cst_46 : f32 to vector<16x128xf32>
    %68 = arith.maximumf %66, %67 : vector<16x128xf32>
    %69 = vector.extract_strided_slice %59 {offsets = [0, 1], sizes = [16, 1], strides = [1, 1]} : vector<16x3xf32> to vector<16x1xf32>
    %70 = vector.broadcast %69 : vector<16x1xf32> to vector<16x128xf32>
    %71 = arith.mulf %68, %70 : vector<16x128xf32>
    %72 = vector.extract_strided_slice %59 {offsets = [0, 2], sizes = [16, 1], strides = [1, 1]} : vector<16x3xf32> to vector<16x1xf32>
    %73 = vector.broadcast %72 : vector<16x1xf32> to vector<16x128xf32>
    %74 = arith.addf %71, %73 : vector<16x128xf32>
    %c16_47 = arith.constant 16 : index
    %c0_48 = arith.constant 0 : index
    %75 = vector.load %arg12[%c16_47, %c0_48] : memref<64x128xf32, #tpu.memory_space<vmem>>, vector<16x128xf32>
    tpu.vector_store %arg12[%c16_47, %c0_48], %74 {strides = array<i32>} : memref<64x128xf32, #tpu.memory_space<vmem>>, vector<16x128xf32>,
    %c32_49 = arith.constant 32 : index
    %c0_50 = arith.constant 0 : index
    %76 = vector.load %arg12[%c32_49, %c0_50] : memref<64x128xf32, #tpu.memory_space<vmem>>, vector<16x128xf32>
    %77 = arith.addf %74, %76 : vector<16x128xf32>
    %cst_51 = arith.constant 0.000000e+00 : f32
    %78 = vector.shape_cast %18 : vector<1x128xi1> to vector<1x128xi1>
    %79 = vector.broadcast %78 : vector<1x128xi1> to vector<16x128xi1>
    %80 = vector.broadcast %cst_51 : f32 to vector<16x128xf32>
    %81 = arith.select %79, %77, %80 : vector<16x128xi1>, vector<16x128xf32>
    %c2_i32_52 = arith.constant 2 : i32
    %82 = tpu.dynamic_rotate %81 by %c2_i32_52 dim 1 : vector<16x128xf32>, i32 -> vector<16x128xf32>
    %c0_53 = arith.constant 0 : index
    %c0_54 = arith.constant 0 : index
    %83 = vector.load %arg13[%c0_53, %c0_54] : memref<48x128xf32, #tpu.memory_space<vmem>>, vector<16x128xf32>
    tpu.vector_store %arg13[%c0_53, %c0_54], %82 {strides = array<i32>} : memref<48x128xf32, #tpu.memory_space<vmem>>, vector<16x128xf32>,
    %c16_55 = arith.constant 16 : index
    %c0_56 = arith.constant 0 : index
    %84 = vector.load %arg13[%c16_55, %c0_56] : memref<48x128xf32, #tpu.memory_space<vmem>>, vector<16x128xf32>
    tpu.vector_store %arg13[%c16_55, %c0_56], %81 {strides = array<i32>} : memref<48x128xf32, #tpu.memory_space<vmem>>, vector<16x128xf32>,
    %c126_i32_57 = arith.constant 126 : i32
    %85 = tpu.dynamic_rotate %81 by %c126_i32_57 dim 1 : vector<16x128xf32>, i32 -> vector<16x128xf32>
    %c32_58 = arith.constant 32 : index
    %c0_59 = arith.constant 0 : index
    %86 = vector.load %arg13[%c32_58, %c0_59] : memref<48x128xf32, #tpu.memory_space<vmem>>, vector<16x128xf32>
    tpu.vector_store %arg13[%c32_58, %c0_59], %85 {strides = array<i32>} : memref<48x128xf32, #tpu.memory_space<vmem>>, vector<16x128xf32>,
    %c2 = arith.constant 2 : index
    %c0_60 = arith.constant 0 : index
    %c0_61 = arith.constant 0 : index
    %87 = vector.load %arg5[%c2, %c0_60, %c0_61] : memref<3x16x3xf32, #tpu.memory_space<vmem>>, vector<1x16x3xf32>
    %88 = vector.shape_cast %87 : vector<1x16x3xf32> to vector<16x3xf32>
    %c2_62 = arith.constant 2 : index
    %c0_63 = arith.constant 0 : index
    %c0_64 = arith.constant 0 : index
    %89 = vector.load %arg4[%c2_62, %c0_63, %c0_64] : memref<3x16x48xf32, #tpu.memory_space<vmem>>, vector<1x16x48xf32>
    %90 = vector.shape_cast %89 : vector<1x16x48xf32> to vector<16x48xf32>
    %c0_65 = arith.constant 0 : index
    %c0_66 = arith.constant 0 : index
    %91 = vector.load %arg13[%c0_65, %c0_66] : memref<48x128xf32, #tpu.memory_space<vmem>>, vector<48x128xf32>
    %cst_67 = arith.constant dense<0.000000e+00> : vector<16x128xf32>
    %92 = tpu.matmul %90, %91, %cst_67 {dimension_numbers = #tpu.dot_dimension_numbers<[1], [0], [0], [1], [0, 0, 1, 1], [], []>} : vector<16x48xf32>, vector<48x128xf32>, vector<16x128xf32> -> vector<16x128xf32>
    %93 = vector.extract_strided_slice %88 {offsets = [0, 0], sizes = [16, 1], strides = [1, 1]} : vector<16x3xf32> to vector<16x1xf32>
    %94 = vector.broadcast %93 : vector<16x1xf32> to vector<16x128xf32>
    %95 = arith.addf %92, %94 : vector<16x128xf32>
    %cst_68 = arith.constant 0.000000e+00 : f32
    %96 = vector.broadcast %cst_68 : f32 to vector<16x128xf32>
    %97 = arith.maximumf %95, %96 : vector<16x128xf32>
    %98 = vector.extract_strided_slice %88 {offsets = [0, 1], sizes = [16, 1], strides = [1, 1]} : vector<16x3xf32> to vector<16x1xf32>
    %99 = vector.broadcast %98 : vector<16x1xf32> to vector<16x128xf32>
    %100 = arith.mulf %97, %99 : vector<16x128xf32>
    %101 = vector.extract_strided_slice %88 {offsets = [0, 2], sizes = [16, 1], strides = [1, 1]} : vector<16x3xf32> to vector<16x1xf32>
    %102 = vector.broadcast %101 : vector<16x1xf32> to vector<16x128xf32>
    %103 = arith.addf %100, %102 : vector<16x128xf32>
    %c32_69 = arith.constant 32 : index
    %c0_70 = arith.constant 0 : index
    %104 = vector.load %arg12[%c32_69, %c0_70] : memref<64x128xf32, #tpu.memory_space<vmem>>, vector<16x128xf32>
    tpu.vector_store %arg12[%c32_69, %c0_70], %103 {strides = array<i32>} : memref<64x128xf32, #tpu.memory_space<vmem>>, vector<16x128xf32>,
    %c0_71 = arith.constant 0 : index
    %c0_72 = arith.constant 0 : index
    %105 = vector.load %arg7[%c0_71, %c0_72] : memref<64x4xf32, #tpu.memory_space<vmem>>, vector<64x4xf32>
    %c0_73 = arith.constant 0 : index
    %c0_74 = arith.constant 0 : index
    %106 = vector.load %arg6[%c0_73, %c0_74] : memref<64x64xf32, #tpu.memory_space<vmem>>, vector<64x64xf32>
    %c0_75 = arith.constant 0 : index
    %c0_76 = arith.constant 0 : index
    %107 = vector.load %arg12[%c0_75, %c0_76] : memref<64x128xf32, #tpu.memory_space<vmem>>, vector<64x128xf32>
    %cst_77 = arith.constant dense<0.000000e+00> : vector<64x128xf32>
    %108 = tpu.matmul %106, %107, %cst_77 {dimension_numbers = #tpu.dot_dimension_numbers<[1], [0], [0], [1], [0, 0, 1, 1], [], []>} : vector<64x64xf32>, vector<64x128xf32>, vector<64x128xf32> -> vector<64x128xf32>
    %109 = vector.extract_strided_slice %105 {offsets = [0, 0], sizes = [64, 1], strides = [1, 1]} : vector<64x4xf32> to vector<64x1xf32>
    %110 = vector.broadcast %109 : vector<64x1xf32> to vector<64x128xf32>
    %111 = arith.addf %108, %110 : vector<64x128xf32>
    %cst_78 = arith.constant 0.000000e+00 : f32
    %112 = vector.broadcast %cst_78 : f32 to vector<64x128xf32>
    %113 = arith.maximumf %111, %112 : vector<64x128xf32>
    %114 = vector.extract_strided_slice %105 {offsets = [0, 1], sizes = [64, 1], strides = [1, 1]} : vector<64x4xf32> to vector<64x1xf32>
    %115 = vector.broadcast %114 : vector<64x1xf32> to vector<64x128xf32>
    %116 = arith.mulf %113, %115 : vector<64x128xf32>
    %117 = vector.extract_strided_slice %105 {offsets = [0, 2], sizes = [64, 1], strides = [1, 1]} : vector<64x4xf32> to vector<64x1xf32>
    %118 = vector.broadcast %117 : vector<64x1xf32> to vector<64x128xf32>
    %119 = arith.addf %116, %118 : vector<64x128xf32>
    %c24_i32_79 = arith.constant 24 : i32
    %120 = vector.broadcast %c24_i32_79 : i32 to vector<1x128xi32>
    %121 = arith.cmpi slt, %16, %120 : vector<1x128xi32>
    %cst_80 = arith.constant 0.000000e+00 : f32
    %122 = vector.shape_cast %121 : vector<1x128xi1> to vector<1x128xi1>
    %123 = vector.broadcast %122 : vector<1x128xi1> to vector<64x128xi1>
    %124 = vector.broadcast %cst_80 : f32 to vector<64x128xf32>
    %125 = arith.select %123, %119, %124 : vector<64x128xi1>, vector<64x128xf32>
    %cst_81 = arith.constant dense<0.000000e+00> : vector<64xf32>
    %126 = vector.multi_reduction <add>, %125, %cst_81 [1] : vector<64x128xf32> to vector<64xf32>
    %127 = vector.shape_cast %126 : vector<64xf32> to vector<64x1xf32>
    %cst_82 = arith.constant 0.0416666679 : f32
    %128 = vector.broadcast %cst_82 : f32 to vector<64x1xf32>
    %129 = arith.mulf %127, %128 : vector<64x1xf32>
    %c0_83 = arith.constant 0 : index
    %c0_84 = arith.constant 0 : index
    %130 = vector.load %arg8[%c0_83, %c0_84] : memref<128x64xf32, #tpu.memory_space<vmem>>, vector<128x64xf32>
    %cst_85 = arith.constant dense<0.000000e+00> : vector<128x1xf32>
    %131 = tpu.matmul %130, %129, %cst_85 {dimension_numbers = #tpu.dot_dimension_numbers<[1], [0], [0], [1], [0, 0, 1, 1], [], []>} : vector<128x64xf32>, vector<64x1xf32>, vector<128x1xf32> -> vector<128x1xf32>
    %c0_86 = arith.constant 0 : index
    %c0_87 = arith.constant 0 : index
    %132 = vector.load %arg9[%c0_86, %c0_87] : memref<128x1xf32, #tpu.memory_space<vmem>>, vector<128x1xf32>
    %133 = arith.addf %131, %132 : vector<128x1xf32>
    %cst_88 = arith.constant 0.000000e+00 : f32
    %134 = vector.broadcast %cst_88 : f32 to vector<128x1xf32>
    %135 = arith.maximumf %133, %134 : vector<128x1xf32>
    %c0_89 = arith.constant 0 : index
    %c0_90 = arith.constant 0 : index
    %136 = vector.load %arg10[%c0_89, %c0_90] : memref<64x128xf32, #tpu.memory_space<vmem>>, vector<64x128xf32>
    %cst_91 = arith.constant dense<0.000000e+00> : vector<64x1xf32>
    %137 = tpu.matmul %136, %135, %cst_91 {dimension_numbers = #tpu.dot_dimension_numbers<[1], [0], [0], [1], [0, 0, 1, 1], [], []>} : vector<64x128xf32>, vector<128x1xf32>, vector<64x1xf32> -> vector<64x1xf32>
    %138 = vector.extract_strided_slice %105 {offsets = [0, 3], sizes = [64, 1], strides = [1, 1]} : vector<64x4xf32> to vector<64x1xf32>
    %139 = arith.addf %137, %138 : vector<64x1xf32>
    %cst_92 = arith.constant 0.000000e+00 : f32
    %140 = vector.broadcast %cst_92 : f32 to vector<64x1xf32>
    %141 = arith.subf %140, %139 : vector<64x1xf32>
    %142 = math.exp %141 : vector<64x1xf32>
    %cst_93 = arith.constant 1.000000e+00 : f32
    %143 = vector.broadcast %cst_93 : f32 to vector<64x1xf32>
    %144 = arith.addf %143, %142 : vector<64x1xf32>
    %cst_94 = arith.constant 1.000000e+00 : f32
    %145 = vector.broadcast %cst_94 : f32 to vector<64x1xf32>
    %146 = arith.divf %145, %144 : vector<64x1xf32>
    %147 = vector.broadcast %146 : vector<64x1xf32> to vector<64x128xf32>
    %148 = arith.mulf %119, %147 : vector<64x128xf32>
    %c0_95 = arith.constant 0 : index
    %c0_96 = arith.constant 0 : index
    %149 = vector.load %arg1[%c0_95, %c0_96] : memref<64x128xf32, #tpu.memory_space<vmem>>, vector<64x128xf32>
    %150 = arith.addf %148, %149 : vector<64x128xf32>
    %c0_97 = arith.constant 0 : index
    %c0_98 = arith.constant 0 : index
    %151 = vector.load %arg11[%c0_97, %c0_98] : memref<64x128xf32, #tpu.memory_space<vmem>>, vector<64x128xf32>
    tpu.vector_store %arg11[%c0_97, %c0_98], %150 {strides = array<i32>} : memref<64x128xf32, #tpu.memory_space<vmem>>, vector<64x128xf32>,
    return
  }
  func.func @transform_0(%arg0: i32) -> (i32, i32) {
    %c0_i32 = arith.constant 0 : i32
    %c0_i32_0 = arith.constant 0 : i32
    return %c0_i32, %arg0 : i32, i32
  }
  func.func @transform_1(%arg0: i32) -> (i32, i32) {
    %c0_i32 = arith.constant 0 : i32
    %c0_i32_0 = arith.constant 0 : i32
    %c0_i32_1 = arith.constant 0 : i32
    return %c0_i32, %c0_i32_0 : i32, i32
  }
  func.func @transform_2(%arg0: i32) -> (i32, i32) {
    %c0_i32 = arith.constant 0 : i32
    %c0_i32_0 = arith.constant 0 : i32
    %c0_i32_1 = arith.constant 0 : i32
    return %c0_i32, %c0_i32_0 : i32, i32
  }
  func.func @transform_3(%arg0: i32) -> (i32, i32, i32) {
    %c0_i32 = arith.constant 0 : i32
    %c0_i32_0 = arith.constant 0 : i32
    %c0_i32_1 = arith.constant 0 : i32
    %c0_i32_2 = arith.constant 0 : i32
    return %c0_i32, %c0_i32_0, %c0_i32_1 : i32, i32, i32
  }
  func.func @transform_4(%arg0: i32) -> (i32, i32, i32) {
    %c0_i32 = arith.constant 0 : i32
    %c0_i32_0 = arith.constant 0 : i32
    %c0_i32_1 = arith.constant 0 : i32
    %c0_i32_2 = arith.constant 0 : i32
    return %c0_i32, %c0_i32_0, %c0_i32_1 : i32, i32, i32
  }
  func.func @transform_5(%arg0: i32) -> (i32, i32) {
    %c0_i32 = arith.constant 0 : i32
    %c0_i32_0 = arith.constant 0 : i32
    %c0_i32_1 = arith.constant 0 : i32
    return %c0_i32, %c0_i32_0 : i32, i32
  }
  func.func @transform_6(%arg0: i32) -> (i32, i32) {
    %c0_i32 = arith.constant 0 : i32
    %c0_i32_0 = arith.constant 0 : i32
    %c0_i32_1 = arith.constant 0 : i32
    return %c0_i32, %c0_i32_0 : i32, i32
  }
  func.func @transform_7(%arg0: i32) -> (i32, i32) {
    %c0_i32 = arith.constant 0 : i32
    %c0_i32_0 = arith.constant 0 : i32
    %c0_i32_1 = arith.constant 0 : i32
    return %c0_i32, %c0_i32_0 : i32, i32
  }
  func.func @transform_8(%arg0: i32) -> (i32, i32) {
    %c0_i32 = arith.constant 0 : i32
    %c0_i32_0 = arith.constant 0 : i32
    %c0_i32_1 = arith.constant 0 : i32
    return %c0_i32, %c0_i32_0 : i32, i32
  }
  func.func @transform_9(%arg0: i32) -> (i32, i32) {
    %c0_i32 = arith.constant 0 : i32
    %c0_i32_0 = arith.constant 0 : i32
    %c0_i32_1 = arith.constant 0 : i32
    return %c0_i32, %c0_i32_0 : i32, i32
  }
  func.func @transform_10(%arg0: i32) -> (i32, i32) {
    %c0_i32 = arith.constant 0 : i32
    %c0_i32_0 = arith.constant 0 : i32
    return %c0_i32, %arg0 : i32, i32
  }
}

</mosaic_0001>

<bundles_post_ra>
// kernel: tpu_custom_call.1
= control target key start
LH: loop header
LB: loop body
LE: loop exit
PB: predicated region body
PF: predicated region fallthrough
CT: control target
= control target key end

     0   :  { %15 = vsyncpa [#allocation6], 0  ;;  %s3444_s0 = inlined_call_operand.vmem [shape: f32[64,256], index: 0, kind: input, shape index: {}]   ;;  %s3445_s1 = inlined_call_operand.vmem [shape: f32[64,64], index: 1, kind: input, shape index: {}]   ;;  %s3446_s2 = inlined_call_operand.vmem [shape: f32[64,3], index: 2, kind: input, shape index: {}]   ;;  %s3447_s3 = inlined_call_operand.vmem [shape: f32[3,16,48], index: 3, kind: input, shape index: {}]   ;;  %s3448_s4 = inlined_call_operand.vmem [shape: f32[3,16,3], index: 4, kind: input, shape index: {}]   ;;  %s3449_s5 = inlined_call_operand.vmem [shape: f32[64,64], index: 5, kind: input, shape index: {}]   ;;  %s3450_s6 = inlined_call_operand.vmem [shape: f32[64,4], index: 6, kind: input, shape index: {}]   ;;  %s3451_s7 = inlined_call_operand.vmem [shape: f32[128,64], index: 7, kind: input, shape index: {}]   ;;  %s3452_s8 = inlined_call_operand.vmem [shape: f32[128,1], index: 8, kind: input, shape index: {}]   ;;  %s3453_s9 = inlined_call_operand.vmem [shape: f32[64,128], index: 9, kind: input, shape index: {}]   ;;  %s3454_s10 = inlined_call_operand.hbm [shape: f32[64,256], index: 10, kind: output, shape index: {}]  }
   0x1   :  { %17 = vsyncpa [#allocation6 + $0x1], 0  ;;  %s2815_s13 = smov 0   ;;  %s2817_s14 = smov 0  }
   0x2   :  { %s2819_s15 = smov 0   ;;  %s2821_s16 = smov 0  }
   0x3 LB: > { %s3456_s17 = sadd.s32 4294967295, %s2748_s16   ;;  %s2045_s18 = sadd.s32 4294967294, %s2748_s16   ;;  %s2748_s16 = sphi %s2821_s16, %s3470_s16   ;;  %s2744_s15 = sphi %s2819_s15, %s3469_s15   ;;  %s2740_s14 = sphi %s2817_s14, %s3468_s14   ;;  %s2736_s13 = sphi %s2815_s13, %s3467_s13  }
   0x4   : > { %s2838_s19 = sadd.s32 1, %s2748_s16   ;;  %s30_s20 = sadd.s32 1, %s2744_s15 }
   0x5   : > { %s27_s21 = ssub.s32 %s2748_s16, %s2838_s19  ;;  %p37_p0 = scmp.ne.s32.totalorder %s2744_s15, %s2740_s14 }
   0x6   : > { %p28_p1 = scmp.eq.s32.totalorder %s27_s21, 0  ;;  %p38_p2 = scmp.eq.s32.totalorder %s2748_s16, 0 }
   0x7   : > { %p256_p3 = scmp.eq.s32.totalorder %s3456_s17, 1  ;;  %p261_p4 = scmp.ne.s32.totalorder %s2740_s14, %s2736_s13 }
   0x8   : > { %s2851_s22 = scalar_select %p28_p1, %s2744_s15, %s30_s20  }
   0x9   : > { %p39_p5 = por %p38_p2, %p37_p0  ;;  %p2853_p6 = por %p256_p3, %p37_p0 }
   0xa   : > { %p262_p7 = scmp.eq.s32.totalorder %s2045_s18, 1  ;;  %p2047_p9 = scmp.ge.s32.totalorder %s2748_s16, 2 }
   0xc   : > { %p2857_p8 = por %p262_p7, %p261_p4  ;;  %305 = sbr.rel (%p2047_p9) target bundleno = 27 (0x1b), region = 52 }
  0x13   : > { %308 = sbr.rel (!%p39_p5) target bundleno = 27 (0x1b), region = 56  ;;  %s310_s25 = sand.u32 (%p39_p5), 1, %s2744_s15  }
  0x14   : > { %s2049_s26 = sshll.u32 (%p39_p5), %s2748_s16, 3  ;;  %s2048_s27 = sshll.u32 (%p39_p5), %s310_s25, 6 }
  0x15   : > { %s314_s30 = scalar_lea.vmem (%p39_p5), %s3444_s0, %s2049_s26  ;;  %s312_s11 = scalar_lea.vmem (%p39_p5), [#allocation4], %s2048_s27 }
  0x16   : > { %v356_v0 = vld [vmem:[%s314_s30] sm:$0xff] (%p39_p5)  ;;  %v358_v1 = vld [vmem:[%s314_s30 + $0x10] sm:$0xff] (%p39_p5) }
  0x17   : > { %v360_v2 = vld [vmem:[%s314_s30 + $0x20] sm:$0xff] (%p39_p5)  ;;  %357 = vst [vmem:[%s312_s11] sm:$0xff] (%p39_p5), %v356_v0  ;;  %359 = vst [vmem:[%s312_s11 + $0x8] sm:$0xff] (%p39_p5), %v358_v1  ;;  %v362_v3 = vld [vmem:[%s314_s30 + $0x30] sm:$0xff] (%p39_p5) }
  0x18   : > { %361 = vst [vmem:[%s312_s11 + $0x10] sm:$0xff] (%p39_p5), %v360_v2  ;;  %v364_v4 = vld [vmem:[%s314_s30 + $0x40] sm:$0xff] (%p39_p5)  ;;  %v366_v5 = vld [vmem:[%s314_s30 + $0x50] sm:$0xff] (%p39_p5)  ;;  %363 = vst [vmem:[%s312_s11 + $0x18] sm:$0xff] (%p39_p5), %v362_v3 }
  0x19   : > { %365 = vst [vmem:[%s312_s11 + $0x20] sm:$0xff] (%p39_p5), %v364_v4  ;;  %367 = vst [vmem:[%s312_s11 + $0x28] sm:$0xff] (%p39_p5), %v366_v5  ;;  %v368_v6 = vld [vmem:[%s314_s30 + $0x60] sm:$0xff] (%p39_p5)  ;;  %v370_v7 = vld [vmem:[%s314_s30 + $0x70] sm:$0xff] (%p39_p5) }
  0x1a   : > { %369 = vst [vmem:[%s312_s11 + $0x30] sm:$0xff] %v368_v6  ;;  %371 = vst [vmem:[%s312_s11 + $0x38] sm:$0xff] %v370_v7 }
  0x1b PF: > { %p2050_p10 = scmp.ge.s32.totalorder %s2748_s16, 1  ;;  %p376_p11 = scmp.lt.s32.totalorder %s2748_s16, 3 }
  0x1d   : > { %p377_p12 = pnand %p2050_p10, %p376_p11 }
  0x1e   : > { %s3455_s12 = sand.u32 (!%p377_p12), 1, %s2740_s14   ;;  %v428_v8 = vld [vmem:[%s3445_s1] sm:$0xff] (!%p377_p12)  ;;  %vm484_vm0 = vcmask (!%p377_p12), 523264   ;;  %v2750_v9 = vmov (!%p377_p12), 0   ;;  %v2751_v11 = vmov (!%p377_p12), 1   ;;  %v421_v12 = vld [vmem:[%s3446_s2 + $0x8] sm:$0xff] (!%p377_p12)  ;;  %v710_v31 = vlaneseq (!%p377_p12) }
  0x1f   : > { %380 = sbr.rel (%p377_p12) target bundleno = 2394 (0x95a), region = 94  ;;  %s2877_s21 = sshll.u32 (!%p377_p12), %s3455_s12, 6  ;;  %2229 = vmatprep.mubr.msk.f32.mxu0 (!%p377_p12), %vm484_vm0, %v428_v8  ;;  %2584 = vset.pattern.permute.xlu0 (!%p377_p12), %v2750_v9  ;;  %v420_v10 = vld [vmem:[%s3446_s2] sm:$0xff] (!%p377_p12)  ;;  %v2752_v24 = vmov (!%p377_p12), 2   ;;  %v429_v26 = vld [vmem:[%s3445_s1 + $0x8] sm:$0xff] (!%p377_p12)  ;;  %v430_v27 = vld [vmem:[%s3445_s1 + $0x10] sm:$0xff] (!%p377_p12) }
  0x20   : > { %2585 = vset.pattern.permute.xlu1 (!%p377_p12), %v2751_v11  ;;  %446 = vperm.xlu0 (!%p377_p12), %2584, %v420_v10   ;;  %s2889_s29 = scalar_lea.vmem (!%p377_p12), [#allocation4], %s2877_s21  ;;  %v431_v28 = vld [vmem:[%s3445_s1 + $0x18] sm:$0xff] (!%p377_p12)  ;;  %v2915_v38 = vand.u32 (!%p377_p12), 127, %v710_v31  ;;  %s3458_s27 = smov (!%p377_p12), 126   ;;  %v735_v51 = vld [vmem:[%s3447_s3] sm:$0xff] (!%p377_p12)  ;;  %vm753_vm2 = vcmask (!%p377_p12), 392192  }
  0x21   : > { %v436_v13 = vld [vmem:[%s2889_s29] sm:$0xff] (!%p377_p12)  ;;  %v437_v14 = vld [vmem:[%s2889_s29 + $0x8] sm:$0xff] (!%p377_p12)  ;;  %v438_v15 = vld [vmem:[%s2889_s29 + $0x10] sm:$0xff] (!%p377_p12)  ;;  %623 = vperm.xlu1 (!%p377_p12), %2585, %v420_v10   ;;  %s3457_s28 = smov (!%p377_p12), 2   ;;  %2253 = vmatprep.mubr.msk.f32.mxu1 (!%p377_p12), %vm753_vm2, %v735_v51  ;;  %s3463_s18 = smov (!%p377_p12), 126  }
  0x22   : > { %v2398_v16 = vpack.c.bf16 (!%p377_p12), %v437_v14, %v436_v13  ;;  %v439_v17 = vld [vmem:[%s2889_s29 + $0x18] sm:$0xff] (!%p377_p12)  ;;  %v440_v19 = vld [vmem:[%s2889_s29 + $0x20] sm:$0xff] (!%p377_p12)  ;;  %v441_v20 = vld [vmem:[%s2889_s29 + $0x28] sm:$0xff] (!%p377_p12)  ;;  %vm712_vm1 = vcmp.lt.s32.totalorder (!%p377_p12), %v2915_v38, 24  ;;  %s3464_s20 = smov (!%p377_p12), 2   ;;  %s2755_s25 = smov (!%p377_p12), 125  }
  0x23   : > { %v2402_v18 = vpack.c.bf16 (!%p377_p12), %v439_v17, %v438_v15  ;;  %v2406_v21 = vpack.c.bf16 (!%p377_p12), %v441_v20, %v440_v19  ;;  %v442_v22 = vld [vmem:[%s2889_s29 + $0x30] sm:$0xff] (!%p377_p12)  ;;  %v443_v23 = vld [vmem:[%s2889_s29 + $0x38] sm:$0xff] (!%p377_p12)  ;;  %v733_v54 = vld [vmem:[%s3448_s4] sm:$0xff] (!%p377_p12)  ;;  %s3368_s11 = scalar_lea.vmem (!%p377_p12), [#allocation5], %s2877_s21  ;;  %s3465_s17 = sadd.s32 (!%p377_p12), 4294967295, %s2748_s16  }
  0x24   : > { %2399 = vmatprep.subr.bf16.mxu0 (!%p377_p12), %v2398_v16  ;;  %451 = vperm.xlu0 (!%p377_p12), %2584, %v421_v12   ;;  %v2410_v25 = vpack.c.bf16 (!%p377_p12), %v443_v23, %v442_v22  ;;  %v422_v52 = vld [vmem:[%s3446_s2 + $0x10] sm:$0xff] (!%p377_p12)  ;;  %v423_v53 = vld [vmem:[%s3446_s2 + $0x18] sm:$0xff] (!%p377_p12)  ;;  %v734_v55 = vld [vmem:[%s3448_s4 + $0x8] sm:$0xff] (!%p377_p12)  ;;  %s1977_s21 = sshll.u32 (!%p377_p12), %s3368_s11, 4  ;;  %s2100_s12 = sshll.u32 (!%p377_p12), %s3465_s17, 7  ;;  %s3390_s21 = int_to_ptr.vmem [resolvable:$true] %s1977_s21 }
  0x25   : > { %2401 = vmatpush3.bf16.msra.mxu0 (!%p377_p12), %v2398_v16  ;;  %627 = vperm.xlu1 (!%p377_p12), %2585, %v421_v12   ;;  %vm2949_vm3 = vmpackc.low (!%p377_p12), %vm712_vm1, %vm712_vm1  ;;  %v736_v3 = vld [vmem:[%s3447_s3 + $0x8] sm:$0xff] (!%p377_p12)  ;;  %v432_v4 = vld [vmem:[%s3445_s1 + $0x20] sm:$0xff] (!%p377_p12)  ;;  %s3466_s26 = sand.u32 (!%p377_p12), 1, %s2740_s14  }
  0x26   : > { %2403 = vmatprep.subr.bf16.mxu0 %v2402_v18  ;;  %v433_v5 = vld [vmem:[%s3445_s1 + $0x28] sm:$0xff]  ;;  %v2064_v51 = vld [vmem:[%s3448_s4 + $0x18] sm:$0xff] }
  0x28   : > { %2586 = vset.pattern.permute.xlu0 %v2752_v24 }
  0x29   : > { %2405 = vmatpush3.bf16.msra.mxu0 %v2402_v18  ;;  %2587 = vset.pattern.permute.xlu1 %v2752_v24 }
  0x2a   : > { %2407 = vmatprep.subr.bf16.mxu0 %v2406_v21  ;;  %667 = vperm.xlu1 %2587, %v421_v12  }
  0x2b   : > { %663 = vperm.xlu0 %2586, %v420_v10  }
  0x2d   : > { %2409 = vmatpush3.bf16.msra.mxu0 %v2406_v21 }
  0x2e   : > { %2411 = vmatprep.subr.bf16.mxu0 %v2410_v25  ;;  %2598 = vset.pattern.permute.xlu1 %v2750_v9 }
  0x2f   : > { %2599 = vset.pattern.permute.xlu0 %v2750_v9 }
  0x31   : > { %2413 = vmatpush3.bf16.msra.mxu0 %v2410_v25 }
  0x34   : > { %2230 = vmatmul.mubr.msk.f32.vlgmr.msra.gmra.mrb[0].mxu0 %vm484_vm0, %v429_v26 }
  0x35   : > { %2232 = vmatprep.mubr.msk.f32.mxu0 %vm484_vm0, %v430_v27 }
  0x38   : > { %2233 = vmatmul.mubr.msk.f32.gmra.mrb[2].mxu0 %vm484_vm0, %v431_v28 }
  0x39   : > { %2235 = vmatprep.mubr.msk.f32.mxu0 %vm484_vm0, %v432_v4 }
  0x3c   : > { %2236 = vmatmul.mubr.msk.f32.gmra.mrb[4].mxu0 %vm484_vm0, %v433_v5 }
  0x9f   : > { %v447_v29 = vpop.permute.xlu0 %446 }
  0xa0   : > { %v624_v30 = vpop.permute.xlu1 %623 }
  0xa3   : > { %v452_v32 = vpop.permute.xlu0 %451 }
  0xa4   : > { %v628_v33 = vpop.permute.xlu1 %627 }
  0xa9   : > { %v668_v41 = vpop.permute.xlu1 %667 }
  0xaa   : > { %v664_v43 = vpop.permute.xlu0 %663 }
 0x107   : > { %v2231_v34 = vpop.f32.mrb[0].mxu0 }
 0x108   : > { %v581_v35 = vadd.f32 %v2231_v34, %v452_v32  ;;  %v575_v36 = vpop.f32.mrb[1].mxu0 }
 0x109   : > { %v576_v37 = vadd.f32 %v575_v36, %v447_v29 }
 0x10a   : > { %v615_v39 = vmax.f32 %v581_v35, 0.0 }
 0x10b   : > { %v614_v40 = vmax.f32 %v576_v37, 0.0  ;;  %v2234_v56 = vpop.f32.mrb[2].mxu0 }
 0x10c   : > { %v655_v42 = vmul.f32 %v628_v33, %v615_v39  ;;  %v585_v57 = vpop.f32.mrb[3].mxu0 }
 0x10d   : > { %v654_v44 = vmul.f32 %v624_v30, %v614_v40 }
 0x10e   : > { %v695_v45 = vadd.f32 %v668_v41, %v655_v42 }
 0x10f   : > { %v694_v46 = vadd.f32 %v664_v43, %v654_v44 }
 0x110   : > { %v718_v47 = vsel %vm712_vm1, %v695_v45, 0.0 }
 0x111   : > { %v717_v48 = vsel %vm712_vm1, %v694_v46, 0.0  ;;  %v2418_v49 = vpack.c.bf16 %v695_v45, %v694_v46 }
 0x112   : > { %v2593_v50 = vpack.i.bf16 %v718_v47, %v717_v48  ;;  %v2065_v47 = vld [vmem:[%s3447_s3 + $0x10] sm:$0xff]  ;;  %v425_v48 = vld [vmem:[%s3446_s2 + $0x28] sm:$0xff] }
 0x114   : > { %2594 = vrot.lane.b32.xlu0 %v2593_v50, %s3458_s27  ;;  %2589 = vrot.lane.b32.xlu1 %v2593_v50, %s3457_s28  ;;  %v2063_v50 = vld [vmem:[%s3448_s4 + $0x10] sm:$0xff] }
 0x118   : > { %456 = vperm.xlu1 %2598, %v422_v52   ;;  %461 = vperm.xlu0 %2599, %v423_v53  }
 0x11c   : > { %745 = vperm.xlu1 %2598, %v733_v54   ;;  %2600 = vset.pattern.permute.xlu0 %v2751_v11 }
 0x11d   : > { %631 = vperm.xlu0 %2600, %v422_v52  }
 0x120   : > { %750 = vperm.xlu1 %2598, %v734_v55  }
 0x121   : > { %842 = vperm.xlu0 %2600, %v734_v55  }
 0x124   : > { %2601 = vset.pattern.permute.xlu1 %v2751_v11 }
 0x125   : > { %635 = vperm.xlu1 %2601, %v423_v53   ;;  %2603 = vset.pattern.permute.xlu0 %v2752_v24 }
 0x126   : > { %675 = vperm.xlu0 %2603, %v423_v53  }
 0x129   : > { %838 = vperm.xlu1 %2601, %v733_v54  }
 0x12a   : > { %2614 = vset.pattern.permute.xlu0 %v2750_v9 }
 0x12d   : > { %2602 = vset.pattern.permute.xlu1 %v2752_v24 }
 0x12e   : > { %671 = vperm.xlu1 %2602, %v422_v52   ;;  %v2237_v52 = vpop.f32.mrb[4].mxu0 }
 0x12f   : > { %v595_v53 = vpop.f32.mrb[5].mxu0 }
 0x132   : > { %848 = vperm.xlu1 %2602, %v733_v54  }
 0x136   : > { %852 = vperm.xlu1 %2602, %v734_v55  }
 0x13a   : > { %2615 = vset.pattern.permute.xlu1 %v2750_v9 }
 0x186   : > { %v2590_v58 = vpop.permute.xlu1 %2589  ;;  %v2595_v61 = vpop.permute.xlu0 %2594 }
 0x187   : > { %v2592_v59 = vunpack.i.h.bf16 %v2590_v58  ;;  %v2591_v60 = vunpack.i.l.bf16 %v2590_v58  ;;  %v2597_v0 = vunpack.i.h.bf16 %v2595_v61  ;;  %v2596_v1 = vunpack.i.l.bf16 %v2595_v61 }
 0x189   : > { %v2414_v62 = vpack.c.bf16 %v2592_v59, %v2591_v60  ;;  %v2424_v2 = vpack.c.bf16 %v2597_v0, %v2596_v1  ;;  %v434_v0 = vld [vmem:[%s3445_s1 + $0x30] sm:$0xff]  ;;  %v435_v1 = vld [vmem:[%s3445_s1 + $0x38] sm:$0xff] }
 0x18a   : > { %2238 = vmatprep.mubr.msk.f32.mxu0 %vm484_vm0, %v434_v0 }
 0x18b   : > { %2415 = vmatprep.subr.bf16.mxu1 %v2414_v62  ;;  %2239 = vmatmul.mubr.msk.f32.gmra.mrb[6].mxu0 %vm484_vm0, %v435_v1 }
 0x18c   : > { %2417 = vmatpush3.bf16.msra.mxu1 %v2414_v62  ;;  %v2066_v62 = vld [vmem:[%s3447_s3 + $0x18] sm:$0xff] }
 0x18d   : > { %2420 = vmatprep.subr.msk.bf16.mxu1 %vm2949_vm3, %v2418_v49 }
 0x190   : > { %2423 = vmatpush3.bf16.msk.msra.mxu1 %vm2949_vm3, %v2418_v49  ;;  %v424_v49 = vld [vmem:[%s3446_s2 + $0x20] sm:$0xff] }
 0x191   : > { %2425 = vmatprep.subr.bf16.mxu1 %v2424_v2 }
 0x194   : > { %2427 = vmatpush3.bf16.msra.mxu1 %v2424_v2 }
 0x197   : > { %2254 = vmatmul.mubr.msk.f32.vlgmr.msra.gmra.mrb[0].mxu1 %vm753_vm2, %v736_v3  ;;  %v457_v6 = vpop.permute.xlu1 %456  ;;  %v462_v12 = vpop.permute.xlu0 %461 }
 0x198   : > { %v591_v15 = vadd.f32 %v2234_v56, %v462_v12  ;;  %v586_v16 = vadd.f32 %v585_v57, %v457_v6  ;;  %2268 = vmatprep.mubr.msk.f32.mxu1 %vm753_vm2, %v2065_v47  ;;  %v427_v47 = vld [vmem:[%s3446_s2 + $0x38] sm:$0xff] }
 0x19a   : > { %v617_v19 = vmax.f32 %v591_v15, 0.0  ;;  %v616_v20 = vmax.f32 %v586_v16, 0.0 }
 0x19b   : > { %v746_v7 = vpop.permute.xlu1 %745 }
 0x19c   : > { %v632_v14 = vpop.permute.xlu0 %631 }
 0x19d   : > { %v656_v29 = vmul.f32 %v632_v14, %v616_v20 }
 0x19f   : > { %v751_v8 = vpop.permute.xlu1 %750 }
 0x1a0   : > { %v843_v18 = vpop.permute.xlu0 %842 }
 0x1a4   : > { %v636_v10 = vpop.permute.xlu1 %635 }
 0x1a5   : > { %v657_v27 = vmul.f32 %v636_v10, %v617_v19  ;;  %v676_v30 = vpop.permute.xlu0 %675 }
 0x1a7   : > { %v697_v35 = vadd.f32 %v676_v30, %v657_v27 }
 0x1a8   : > { %v839_v13 = vpop.permute.xlu1 %838 }
 0x1ad   : > { %v672_v17 = vpop.permute.xlu1 %671 }
 0x1ae   : > { %v696_v37 = vadd.f32 %v672_v17, %v656_v29 }
 0x1b1   : > { %v849_v21 = vpop.permute.xlu1 %848 }
 0x1b5   : > { %v853_v33 = vpop.permute.xlu1 %852 }
 0x26a   : > { %v2255_v22 = vpop.f32.mrb[0].mxu1 }
 0x26b   : > { %v832_v23 = vadd.f32 %v2255_v22, %v751_v8  ;;  %v826_v25 = vpop.f32.mrb[1].mxu1 }
 0x26c   : > { %v827_v26 = vadd.f32 %v826_v25, %v746_v7 }
 0x26d   : > { %v836_v28 = vmax.f32 %v832_v23, 0.0 }
 0x26e   : > { %v835_v31 = vmax.f32 %v827_v26, 0.0 }
 0x26f   : > { %v846_v32 = vmul.f32 %v843_v18, %v836_v28 }
 0x270   : > { %v845_v34 = vmul.f32 %v839_v13, %v835_v31 }
 0x271   : > { %v856_v36 = vadd.f32 %v853_v33, %v846_v32 }
 0x272   : > { %v855_v39 = vadd.f32 %v849_v21, %v845_v34 }
 0x273   : > { %v862_v40 = vadd.f32 %v856_v36, %v697_v35 }
 0x274   : > { %v861_v41 = vadd.f32 %v855_v39, %v696_v37  ;;  %v2456_v42 = vpack.c.bf16 %v856_v36, %v855_v39 }
 0x275   : > { %v864_v43 = vsel %vm712_vm1, %v862_v40, 0.0 }
 0x276   : > { %v863_v44 = vsel %vm712_vm1, %v861_v41, 0.0  ;;  %v2432_v45 = vpack.c.bf16 %v862_v40, %v861_v41 }
 0x277   : > { %v2609_v46 = vpack.i.bf16 %v864_v43, %v863_v44  ;;  %v2071_v43 = vld [vmem:[%s3447_s3 + $0x20] sm:$0xff] }
 0x278   : > { %2283 = vmatprep.mubr.msk.f32.mxu0 %vm753_vm2, %v2071_v43  ;;  %v2069_v44 = vld [vmem:[%s3448_s4 + $0x20] sm:$0xff]  ;;  %v1168_v43 = vld [vmem:[%s3449_s5 + $0x38] sm:$0xff] }
 0x279   : > { %2610 = vrot.lane.b32.xlu1 %v2609_v46, %s3458_s27  ;;  %2605 = vrot.lane.b32.xlu0 %v2609_v46, %s3457_s28  ;;  %v426_v46 = vld [vmem:[%s3446_s2 + $0x30] sm:$0xff]  ;;  %s3402_s27 = scalar_lea.sflag [#allocation6], %s3466_s26  ;;  %s2756_s28 = smov [#allocation5]  }
 0x27a   : > { %s2690_s30 = sshll.u32 %s2756_s28, 4  ;;  %s2691_s30 = int_to_ptr.vmem [resolvable:$false] %s2690_s30 }
 0x27b   : > { %s2692_s17 = scalar_lea.vmem %s2691_s30, 2048  ;;  %p2693_p2 = scmp.lt.s32.totalorder %s3390_s21, %s2691_s30 }
 0x27d   : > { %471 = vperm.xlu1 %2615, %v425_v48   ;;  %466 = vperm.xlu0 %2614, %v424_v49  }
 0x281   : > { %893 = vperm.xlu1 %2615, %v2063_v50   ;;  %898 = vperm.xlu0 %2614, %v2064_v51  }
 0x285   : > { %2616 = vset.pattern.permute.xlu1 %v2751_v11  ;;  %2617 = vset.pattern.permute.xlu0 %v2751_v11 }
 0x286   : > { %639 = vperm.xlu1 %2616, %v424_v49   ;;  %643 = vperm.xlu0 %2617, %v425_v48  }
 0x28a   : > { %985 = vperm.xlu1 %2616, %v2063_v50   ;;  %2618 = vset.pattern.permute.xlu0 %v2752_v24 }
 0x28b   : > { %679 = vperm.xlu0 %2618, %v424_v49  }
 0x28e   : > { %989 = vperm.xlu1 %2616, %v2064_v51  }
 0x28f   : > { %999 = vperm.xlu0 %2618, %v2064_v51  }
 0x292   : > { %2619 = vset.pattern.permute.xlu1 %v2752_v24 }
 0x293   : > { %683 = vperm.xlu1 %2619, %v425_v48   ;;  %2631 = vset.pattern.permute.xlu0 %v2750_v9  ;;  %v2240_v48 = vpop.f32.mrb[6].mxu0 }
 0x294   : > { %v605_v49 = vpop.f32.mrb[7].mxu0 }
 0x297   : > { %995 = vperm.xlu1 %2619, %v2063_v50  }
 0x29b   : > { %2630 = vset.pattern.permute.xlu1 %v2750_v9 }
 0x2eb   : > { %v2606_v54 = vpop.permute.xlu0 %2605  ;;  %v2611_v57 = vpop.permute.xlu1 %2610 }
 0x2ec   : > { %v2608_v55 = vunpack.i.h.bf16 %v2606_v54  ;;  %v2607_v56 = vunpack.i.l.bf16 %v2606_v54  ;;  %v2613_v59 = vunpack.i.h.bf16 %v2611_v57  ;;  %v2612_v60 = vunpack.i.l.bf16 %v2611_v57 }
 0x2ee   : > { %v2428_v58 = vpack.c.bf16 %v2608_v55, %v2607_v56  ;;  %v2438_v61 = vpack.c.bf16 %v2613_v59, %v2612_v60 }
 0x2f0   : > { %2429 = vmatprep.subr.bf16.mxu1 %v2428_v58 }
 0x2f1   : > { %2431 = vmatpush3.bf16.msra.mxu1 %v2428_v58  ;;  %v2072_v58 = vld [vmem:[%s3447_s3 + $0x28] sm:$0xff] }
 0x2f2   : > { %2434 = vmatprep.subr.msk.bf16.mxu1 %vm2949_vm3, %v2432_v45 }
 0x2f5   : > { %2437 = vmatpush3.bf16.msk.msra.mxu1 %vm2949_vm3, %v2432_v45  ;;  %v2070_v45 = vld [vmem:[%s3448_s4 + $0x28] sm:$0xff] }
 0x2f6   : > { %2439 = vmatprep.subr.bf16.mxu1 %v2438_v61 }
 0x2f9   : > { %2441 = vmatpush3.bf16.msra.mxu1 %v2438_v61 }
 0x2fa   : > { %2457 = vmatprep.subr.bf16.mxu1 %v2456_v42 }
 0x2fc   : > { %2269 = vmatmul.mubr.msk.f32.vlgmr.msra.gmra.mrb[2].mxu1 %vm753_vm2, %v2066_v62  ;;  %v472_v2 = vpop.permute.xlu1 %471  ;;  %v467_v5 = vpop.permute.xlu0 %466 }
 0x2fd   : > { %2459 = vmatpush3.bf16.msra.mxu1 %v2456_v42  ;;  %v601_v8 = vadd.f32 %v2237_v52, %v472_v2  ;;  %v596_v10 = vadd.f32 %v595_v53, %v467_v5 }
 0x2ff   : > { %v619_v14 = vmax.f32 %v601_v8, 0.0  ;;  %v618_v15 = vmax.f32 %v596_v10, 0.0 }
 0x300   : > { %v894_v3 = vpop.permute.xlu1 %893  ;;  %v899_v7 = vpop.permute.xlu0 %898 }
 0x305   : > { %v640_v4 = vpop.permute.xlu1 %639  ;;  %v644_v13 = vpop.permute.xlu0 %643 }
 0x306   : > { %v659_v21 = vmul.f32 %v644_v13, %v619_v14  ;;  %v658_v25 = vmul.f32 %v640_v4, %v618_v15 }
 0x309   : > { %v986_v6 = vpop.permute.xlu1 %985 }
 0x30a   : > { %v680_v19 = vpop.permute.xlu0 %679 }
 0x30b   : > { %v698_v33 = vadd.f32 %v680_v19, %v658_v25  ;;  %v3070_v19 = vld [vmem:[%s3450_s6 + $0x8] sm:$0xff]  ;;  %v3102_v25 = vld [vmem:[%s3450_s6 + $0x30] sm:$0xff] }
 0x30d   : > { %v990_v12 = vpop.permute.xlu1 %989 }
 0x30e   : > { %v1000_v29 = vpop.permute.xlu0 %999 }
 0x312   : > { %v684_v22 = vpop.permute.xlu1 %683 }
 0x313   : > { %v699_v30 = vadd.f32 %v684_v22, %v659_v21  ;;  %v3082_v21 = vld [vmem:[%s3450_s6 + $0x10] sm:$0xff]  ;;  %v3087_v22 = vld [vmem:[%s3450_s6 + $0x18] sm:$0xff] }
 0x316   : > { %v996_v31 = vpop.permute.xlu1 %995 }
 0x3cf   : > { %v2270_v16 = vpop.f32.mrb[2].mxu1 }
 0x3d0   : > { %v979_v17 = vadd.f32 %v2270_v16, %v899_v7  ;;  %v973_v18 = vpop.f32.mrb[3].mxu1 }
 0x3d1   : > { %v974_v20 = vadd.f32 %v973_v18, %v894_v3  ;;  %v1161_v18 = vld [vmem:[%s3449_s5] sm:$0xff] }
 0x3d2   : > { %v983_v23 = vmax.f32 %v979_v17, 0.0  ;;  %2302 = vmatprep.mubr.msk.f32.mxu1 %vm484_vm0, %v1161_v18 }
 0x3d3   : > { %v982_v26 = vmax.f32 %v974_v20, 0.0  ;;  %v3075_v20 = vld [vmem:[%s3450_s6] sm:$0xff] }
 0x3d4   : > { %v993_v27 = vmul.f32 %v990_v12, %v983_v23  ;;  %v3094_v23 = vld [vmem:[%s3450_s6 + $0x20] sm:$0xff] }
 0x3d5   : > { %v992_v28 = vmul.f32 %v986_v6, %v982_v26  ;;  %v3113_v26 = vld [vmem:[%s3450_s6 + $0x28] sm:$0xff] }
 0x3d6   : > { %v1003_v32 = vadd.f32 %v1000_v29, %v993_v27  ;;  %v3131_v27 = vld [vmem:[%s3450_s6 + $0x38] sm:$0xff] }
 0x3d7   : > { %v1002_v34 = vadd.f32 %v996_v31, %v992_v28 }
 0x3d8   : > { %v1009_v35 = vadd.f32 %v1003_v32, %v699_v30 }
 0x3d9   : > { %v1008_v36 = vadd.f32 %v1002_v34, %v698_v33  ;;  %v2460_v37 = vpack.c.bf16 %v1003_v32, %v1002_v34 }
 0x3da   : > { %v1011_v39 = vsel %vm712_vm1, %v1009_v35, 0.0 }
 0x3db   : > { %v1010_v40 = vsel %vm712_vm1, %v1008_v36, 0.0  ;;  %v2446_v41 = vpack.c.bf16 %v1009_v35, %v1008_v36  ;;  %2461 = vmatprep.subr.bf16.mxu1 %v2460_v37 }
 0x3dc   : > { %2463 = vmatpush3.bf16.msra.mxu1 %v2460_v37  ;;  %v2625_v42 = vpack.i.bf16 %v1011_v39, %v1010_v40  ;;  %v1163_v37 = vld [vmem:[%s3449_s5 + $0x10] sm:$0xff]  ;;  %v1164_v39 = vld [vmem:[%s3449_s5 + $0x18] sm:$0xff]  ;;  %v1165_v40 = vld [vmem:[%s3449_s5 + $0x20] sm:$0xff] }
 0x3de   : > { %2626 = vrot.lane.b32.xlu0 %v2625_v42, %s3463_s18  ;;  %2621 = vrot.lane.b32.xlu1 %v2625_v42, %s3464_s20  ;;  %v1167_v42 = vld [vmem:[%s3449_s5 + $0x30] sm:$0xff] }
 0x3e2   : > { %1040 = vperm.xlu1 %2630, %v2069_v44   ;;  %1045 = vperm.xlu0 %2631, %v2070_v45  }
 0x3e6   : > { %476 = vperm.xlu1 %2630, %v426_v46   ;;  %2632 = vset.pattern.permute.xlu0 %v2751_v11 }
 0x3e7   : > { %1132 = vperm.xlu0 %2632, %v2069_v44  }
 0x3ea   : > { %481 = vperm.xlu1 %2630, %v427_v47  }
 0x3eb   : > { %2635 = vset.pattern.permute.xlu0 %v2752_v24 }
 0x3ec   : > { %1146 = vperm.xlu0 %2635, %v2070_v45  }
 0x3ee   : > { %2633 = vset.pattern.permute.xlu1 %v2751_v11 }
 0x3ef   : > { %1136 = vperm.xlu1 %2633, %v2070_v45  }
 0x3f0   : > { %687 = vperm.xlu0 %2635, %v426_v46  }
 0x3f3   : > { %2634 = vset.pattern.permute.xlu1 %v2752_v24 }
 0x3f4   : > { %1142 = vperm.xlu1 %2634, %v2069_v44   ;;  %2638 = vset.pattern.permute.xlu0 %v2750_v9 }
 0x3f5   : > { %1179 = vperm.xlu0 %2638, %v3075_v20  }
 0x3f8   : > { %2636 = vset.pattern.permute.xlu1 %v2751_v11 }
 0x3f9   : > { %647 = vperm.xlu1 %2636, %v426_v46   ;;  %1194 = vperm.xlu0 %2638, %v3087_v22  }
 0x3fd   : > { %651 = vperm.xlu1 %2636, %v427_v47   ;;  %1199 = vperm.xlu0 %2638, %v3094_v23  }
 0x401   : > { %2637 = vset.pattern.permute.xlu1 %v2752_v24  ;;  %1209 = vperm.xlu0 %2638, %v3102_v25  }
 0x402   : > { %691 = vperm.xlu1 %2637, %v427_v47  }
 0x405   : > { %2645 = vset.pattern.permute.xlu0 %v2751_v11 }
 0x406   : > { %2639 = vset.pattern.permute.xlu1 %v2750_v9  ;;  %1359 = vperm.xlu0 %2645, %v3070_v19  }
 0x407   : > { %1184 = vperm.xlu1 %2639, %v3070_v19  }
 0x40a   : > { %1367 = vperm.xlu0 %2645, %v3087_v22  }
 0x40b   : > { %1189 = vperm.xlu1 %2639, %v3082_v21  }
 0x40e   : > { %1375 = vperm.xlu0 %2645, %v3113_v26  }
 0x40f   : > { %2640 = vset.pattern.permute.xlu1 %v2751_v11 }
 0x410   : > { %1355 = vperm.xlu1 %2640, %v3075_v20  }
 0x412   : > { %1379 = vperm.xlu0 %2645, %v3102_v25  }
 0x414   : > { %2641 = vset.pattern.permute.xlu1 %v2752_v24 }
 0x415   : > { %1395 = vperm.xlu1 %2641, %v3075_v20  }
 0x416   : > { %2650 = vset.pattern.permute.xlu0 %v2752_v24 }
 0x417   : > { %1419 = vperm.xlu0 %2650, %v3102_v25  }
 0x419   : > { %1399 = vperm.xlu1 %2641, %v3070_v19  }
 0x41b   : > { %2652 = vset.pattern.permute.xlu0 %v2750_v9 }
 0x41d   : > { %2642 = vset.pattern.permute.xlu1 %v2750_v9 }
 0x41e   : > { %1204 = vperm.xlu1 %2642, %v3113_v26  }
 0x422   : > { %2643 = vset.pattern.permute.xlu1 %v2751_v11 }
 0x423   : > { %1363 = vperm.xlu1 %2643, %v3082_v21  }
 0x427   : > { %2644 = vset.pattern.permute.xlu1 %v2752_v24 }
 0x428   : > { %1403 = vperm.xlu1 %2644, %v3082_v21  }
 0x42c   : > { %1407 = vperm.xlu1 %2644, %v3087_v22  }
 0x430   : > { %2646 = vset.pattern.permute.xlu1 %v2750_v9 }
 0x431   : > { %1214 = vperm.xlu1 %2646, %v3131_v27  }
 0x435   : > { %2647 = vset.pattern.permute.xlu1 %v2751_v11 }
 0x436   : > { %1371 = vperm.xlu1 %2647, %v3094_v23  }
 0x43a   : > { %2648 = vset.pattern.permute.xlu1 %v2752_v24 }
 0x43b   : > { %1411 = vperm.xlu1 %2648, %v3094_v23  }
 0x43f   : > { %1415 = vperm.xlu1 %2648, %v3113_v26  }
 0x443   : > { %2649 = vset.pattern.permute.xlu1 %v2751_v11 }
 0x444   : > { %1383 = vperm.xlu1 %2649, %v3131_v27  }
 0x448   : > { %2651 = vset.pattern.permute.xlu1 %v2752_v24 }
 0x449   : > { %1423 = vperm.xlu1 %2651, %v3131_v27  }
 0x44d   : > { %2653 = vset.pattern.permute.xlu1 %v2750_v9  ;;  %v1162_v9 = vld [vmem:[%s3449_s5 + $0x8] sm:$0xff] }
 0x450   : > { %v2622_v50 = vpop.permute.xlu1 %2621  ;;  %v2627_v53 = vpop.permute.xlu0 %2626 }
 0x451   : > { %v2624_v51 = vunpack.i.h.bf16 %v2622_v50  ;;  %v2623_v52 = vunpack.i.l.bf16 %v2622_v50  ;;  %v2629_v55 = vunpack.i.h.bf16 %v2627_v53  ;;  %v2628_v56 = vunpack.i.l.bf16 %v2627_v53 }
 0x453   : > { %v2442_v54 = vpack.c.bf16 %v2624_v51, %v2623_v52  ;;  %v2452_v57 = vpack.c.bf16 %v2629_v55, %v2628_v56 }
 0x455   : > { %2443 = vmatprep.subr.bf16.mxu0 %v2442_v54 }
 0x456   : > { %2445 = vmatpush3.bf16.msra.mxu0 %v2442_v54 }
 0x457   : > { %2448 = vmatprep.subr.msk.bf16.mxu0 %vm2949_vm3, %v2446_v41 }
 0x45a   : > { %2451 = vmatpush3.bf16.msk.msra.mxu0 %vm2949_vm3, %v2446_v41  ;;  %v1166_v41 = vld [vmem:[%s3449_s5 + $0x28] sm:$0xff] }
 0x45b   : > { %2453 = vmatprep.subr.bf16.mxu0 %v2452_v57 }
 0x45e   : > { %2455 = vmatpush3.bf16.msra.mxu0 %v2452_v57 }
 0x461   : > { %2284 = vmatmul.mubr.msk.f32.vlgmr.msra.gmra.mrb[8].mxu0 %vm753_vm2, %v2072_v58  ;;  %v3051_v59 = vpop.permute.xlu1 %1040  ;;  %v3053_v62 = vpop.permute.xlu0 %1045 }
 0x465   : > { %v477_v60 = vpop.permute.xlu1 %476 }
 0x466   : > { %v3057_v1 = vpop.permute.xlu0 %1132  ;;  %v606_v2 = vadd.f32 %v605_v49, %v477_v60 }
 0x468   : > { %v620_v6 = vmax.f32 %v606_v2, 0.0 }
 0x469   : > { %v482_v61 = vpop.permute.xlu1 %481 }
 0x46a   : > { %v611_v3 = vadd.f32 %v2240_v48, %v482_v61 }
 0x46b   : > { %v3061_v4 = vpop.permute.xlu0 %1146 }
 0x46c   : > { %v621_v7 = vmax.f32 %v611_v3, 0.0 }
 0x46e   : > { %v3055_v0 = vpop.permute.xlu1 %1136 }
 0x46f   : > { %v688_v12 = vpop.permute.xlu0 %687 }
 0x473   : > { %v3059_v63 = vpop.permute.xlu1 %1142 }
 0x474   : > { %v1180_v50 = vpop.permute.xlu0 %1179 }
 0x478   : > { %v648_v5 = vpop.permute.xlu1 %647  ;;  %v1195_v52 = vpop.permute.xlu0 %1194 }
 0x479   : > { %v660_v10 = vmul.f32 %v648_v5, %v620_v6 }
 0x47b   : > { %v700_v14 = vadd.f32 %v688_v12, %v660_v10 }
 0x47c   : > { %v652_v8 = vpop.permute.xlu1 %651  ;;  %v1200_v54 = vpop.permute.xlu0 %1199 }
 0x47d   : > { %v661_v13 = vmul.f32 %v652_v8, %v621_v7 }
 0x480   : > { %v1210_v57 = vpop.permute.xlu0 %1209 }
 0x481   : > { %v692_v15 = vpop.permute.xlu1 %691 }
 0x482   : > { %v701_v16 = vadd.f32 %v692_v15, %v661_v13 }
 0x484   : > { %v2468_v17 = vpack.c.bf16 %v701_v16, %v700_v14 }
 0x486   : > { %v1185_v44 = vpop.permute.xlu1 %1184 }
 0x48a   : > { %v1190_v45 = vpop.permute.xlu1 %1189 }
 0x48f   : > { %v1356_v46 = vpop.permute.xlu1 %1355 }
 0x494   : > { %v1396_v47 = vpop.permute.xlu1 %1395 }
 0x498   : > { %v1400_v48 = vpop.permute.xlu1 %1399 }
 0x49d   : > { %v1205_v49 = vpop.permute.xlu1 %1204 }
 0x4a2   : > { %v1364_v51 = vpop.permute.xlu1 %1363 }
 0x4a7   : > { %v1404_v53 = vpop.permute.xlu1 %1403 }
 0x4ab   : > { %v1408_v55 = vpop.permute.xlu1 %1407 }
 0x4b0   : > { %v1215_v56 = vpop.permute.xlu1 %1214 }
 0x4b5   : > { %v1372_v58 = vpop.permute.xlu1 %1371 }
 0x4ba   : > { %v1412_v61 = vpop.permute.xlu1 %1411 }
 0x4be   : > { %v1416_v12 = vpop.permute.xlu1 %1415 }
 0x534   : > { %v2285_v28 = vpop.f32.mrb[8].mxu0 }
 0x535   : > { %v1126_v29 = vadd.f32 %v2285_v28, %v3053_v62  ;;  %v1120_v30 = vpop.f32.mrb[9].mxu0 }
 0x536   : > { %v1121_v31 = vadd.f32 %v1120_v30, %v3051_v59  ;;  %v1360_v59 = vpop.permute.xlu0 %1359 }
 0x537   : > { %v1130_v32 = vmax.f32 %v1126_v29, 0.0 }
 0x538   : > { %v1129_v33 = vmax.f32 %v1121_v31, 0.0 }
 0x539   : > { %v1140_v34 = vmul.f32 %v3055_v0, %v1130_v32 }
 0x53a   : > { %v1139_v11 = vmul.f32 %v3057_v1, %v1129_v33  ;;  %v1368_v62 = vpop.permute.xlu0 %1367 }
 0x53b   : > { %v1150_v35 = vadd.f32 %v3061_v4, %v1140_v34 }
 0x53c   : > { %v1149_v24 = vadd.f32 %v3059_v63, %v1139_v11  ;;  %v1384_v11 = vpop.permute.xlu1 %1383 }
 0x53e   : > { %v2464_v36 = vpack.c.bf16 %v1150_v35, %v1149_v24  ;;  %v1376_v13 = vpop.permute.xlu0 %1375 }
 0x540   : > { %2465 = vmatprep.subr.bf16.mxu1 %v2464_v36 }
 0x541   : > { %2467 = vmatpush3.bf16.msra.mxu1 %v2464_v36 }
 0x542   : > { %2469 = vmatprep.subr.bf16.mxu1 %v2468_v17 }
 0x545   : > { %2471 = vmatpush3.bf16.msra.mxu1 %v2468_v17 }
 0x548   : > { %2303 = vmatmul.mubr.msk.f32.vlgmr.msra.gmra.mrb[4].mxu1 %vm484_vm0, %v1162_v9 }
 0x549   : > { %2305 = vmatprep.mubr.msk.f32.mxu1 %vm484_vm0, %v1163_v37 }
 0x54c   : > { %2306 = vmatmul.mubr.msk.f32.gmra.mrb[6].mxu1 %vm484_vm0, %v1164_v39  ;;  %v1380_v39 = vpop.permute.xlu0 %1379 }
 0x54d   : > { %2308 = vmatprep.mubr.msk.f32.mxu1 %vm484_vm0, %v1165_v40 }
 0x550   : > { %2309 = vmatmul.mubr.msk.f32.gmra.mrb[8].mxu1 %vm484_vm0, %v1166_v41 }
 0x551   : > { %2311 = vmatprep.mubr.msk.f32.mxu1 %vm484_vm0, %v1167_v42 }
 0x554   : > { %2312 = vmatmul.mubr.msk.f32.gmra.mrb[10].mxu1 %vm484_vm0, %v1168_v43 }
 0x61b   : > { %v2304_v60 = vpop.f32.mrb[4].mxu1 }
 0x61c   : > { %v1313_v0 = vadd.f32 %v2304_v60, %v1185_v44  ;;  %v1307_v1 = vpop.f32.mrb[5].mxu1 }
 0x61d   : > { %v1308_v63 = vadd.f32 %v1307_v1, %v1180_v50  ;;  %v1424_v50 = vpop.permute.xlu1 %1423 }
 0x61e   : > { %v1347_v2 = vmax.f32 %v1313_v0, 0.0 }
 0x61f   : > { %v1346_v3 = vmax.f32 %v1308_v63, 0.0  ;;  %v2307_v4 = vpop.f32.mrb[6].mxu1 }
 0x620   : > { %v1387_v5 = vmul.f32 %v1360_v59, %v1347_v2  ;;  %v1323_v6 = vadd.f32 %v2307_v4, %v1195_v52  ;;  %v1317_v7 = vpop.f32.mrb[7].mxu1 }
 0x621   : > { %v1386_v8 = vmul.f32 %v1356_v46, %v1346_v3  ;;  %v1318_v10 = vadd.f32 %v1317_v7, %v1190_v45 }
 0x622   : > { %v1349_v14 = vmax.f32 %v1323_v6, 0.0  ;;  %v3179_v15 = vadd.f32 %v1400_v48, %v1387_v5 }
 0x623   : > { %v1348_v16 = vmax.f32 %v1318_v10, 0.0  ;;  %v2310_v17 = vpop.f32.mrb[8].mxu1  ;;  %v3181_v18 = vadd.f32 %v1396_v47, %v1386_v8 }
 0x624   : > { %v1389_v28 = vmul.f32 %v1368_v62, %v1349_v14  ;;  %v1333_v29 = vadd.f32 %v2310_v17, %v1205_v49  ;;  %v1327_v30 = vpop.f32.mrb[9].mxu1  ;;  %v1435_v31 = vsel %vm712_vm1, %v3179_v15, 0.0 }
 0x625   : > { %v1388_v32 = vmul.f32 %v1364_v51, %v1348_v16  ;;  %v1328_v33 = vadd.f32 %v1327_v30, %v1200_v54  ;;  %1444 = vadd.xlane.f32.xlu0 %v1435_v31  ;;  %v1434_v34 = vsel %vm712_vm1, %v3181_v18, 0.0  ;;  %v1467_v30 = vld [vmem:[%s3451_s7 + $0x8] sm:$0xff]  ;;  %v1468_v31 = vld [vmem:[%s3451_s7 + $0x10] sm:$0xff] }
 0x626   : > { %v1351_v35 = vmax.f32 %v1333_v29, 0.0  ;;  %1442 = vadd.xlane.f32.xlu1 %v1434_v34  ;;  %v3189_v24 = vadd.f32 %v1408_v55, %v1389_v28  ;;  %v1471_v34 = vld [vmem:[%s3451_s7 + $0x28] sm:$0xff] }
 0x627   : > { %v1350_v36 = vmax.f32 %v1328_v33, 0.0  ;;  %v2313_v9 = vpop.f32.mrb[10].mxu1  ;;  %v3191_v37 = vadd.f32 %v1404_v53, %v1388_v32  ;;  %v1420_v53 = vpop.permute.xlu0 %1419  ;;  %v1469_v32 = vld [vmem:[%s3451_s7 + $0x18] sm:$0xff]  ;;  %v1470_v33 = vld [vmem:[%s3451_s7 + $0x20] sm:$0xff] }
 0x628   : > { %v1391_v40 = vmul.f32 %v1376_v13, %v1351_v35  ;;  %v1343_v41 = vadd.f32 %v2313_v9, %v1215_v56  ;;  %v1337_v42 = vpop.f32.mrb[11].mxu1  ;;  %v1437_v43 = vsel %vm712_vm1, %v3189_v24, 0.0  ;;  %v1473_v35 = vld [vmem:[%s3451_s7 + $0x38] sm:$0xff]  ;;  %v1475_v9 = vld [vmem:[%s3451_s7 + $0x48] sm:$0xff] }
 0x629   : > { %v1390_v44 = vmul.f32 %v1372_v58, %v1350_v36  ;;  %v1338_v45 = vadd.f32 %v1337_v42, %v1210_v57  ;;  %v1436_v46 = vsel %vm712_vm1, %v3191_v37, 0.0  ;;  %v1474_v36 = vld [vmem:[%s3451_s7 + $0x40] sm:$0xff]  ;;  %v1479_v42 = vld [vmem:[%s3451_s7 + $0x68] sm:$0xff] }
 0x62a   : > { %v3199_v47 = vadd.f32 %v1416_v12, %v1391_v40  ;;  %v1353_v48 = vmax.f32 %v1343_v41, 0.0  ;;  %1446 = vadd.xlane.f32.xlu0 %v1436_v46  ;;  %1448 = vadd.xlane.f32.xlu1 %v1437_v43  ;;  %v1477_v40 = vld [vmem:[%s3451_s7 + $0x58] sm:$0xff]  ;;  %v1478_v41 = vld [vmem:[%s3451_s7 + $0x60] sm:$0xff]  ;;  %v1480_v43 = vld [vmem:[%s3451_s7 + $0x70] sm:$0xff] }
 0x62b   : > { %v1352_v49 = vmax.f32 %v1338_v45, 0.0  ;;  %v3201_v51 = vadd.f32 %v1412_v61, %v1390_v44  ;;  %v1466_v61 = vld [vmem:[%s3451_s7] sm:$0xff]  ;;  %v1481_v44 = vld [vmem:[%s3451_s7 + $0x78] sm:$0xff]  ;;  %v1709_v46 = vld [vmem:[%s3453_s9 + $0x10] sm:$0xff] }
 0x62c   : > { %v1393_v52 = vmul.f32 %v1384_v11, %v1353_v48  ;;  %v1439_v54 = vsel %vm712_vm1, %v3199_v47, 0.0  ;;  %2330 = vmatprep.mubr.msk.f32.mxu0 %vm484_vm0, %v1466_v61  ;;  %v1472_v11 = vld [vmem:[%s3451_s7 + $0x30] sm:$0xff]  ;;  %v1707_v45 = vld [vmem:[%s3453_s9] sm:$0xff]  ;;  %2389 = vmatprep.mubr.f32.mxu1 %v1709_v46  ;;  %v1483_v48 = vld [vmem:[%s3452_s8 + $0x8] sm:$0xff] }
 0x62d   : > { %v1392_v55 = vmul.f32 %v1380_v39, %v1352_v49  ;;  %v1438_v56 = vsel %vm712_vm1, %v3201_v51, 0.0  ;;  %v1476_v39 = vld [vmem:[%s3451_s7 + $0x50] sm:$0xff] }
 0x62e   : > { %v3209_v57 = vadd.f32 %v1424_v50, %v1393_v52  ;;  %1450 = vadd.xlane.f32.xlu0 %v1438_v56  ;;  %1452 = vadd.xlane.f32.xlu1 %v1439_v54  ;;  %v1487_v56 = vld [vmem:[%s3452_s8 + $0x28] sm:$0xff] }
 0x62f   : > { %v3211_v58 = vadd.f32 %v1420_v53, %v1392_v55 }
 0x630   : > { %v1441_v59 = vsel %vm712_vm1, %v3209_v57, 0.0 }
 0x631   : > { %v1440_v60 = vsel %vm712_vm1, %v3211_v58, 0.0 }
 0x632   : > { %1454 = vadd.xlane.f32.xlu0 %v1440_v60  ;;  %1456 = vadd.xlane.f32.xlu1 %v1441_v59  ;;  %v1486_v60 = vld [vmem:[%s3452_s8 + $0x20] sm:$0xff] }
 0x643   : > { %1717 = vrot.lane.b32.xlu1 %v3070_v19, %s2755_s25  ;;  %v1482_v19 = vld [vmem:[%s3452_s8] sm:$0xff] }
 0x647   : > { %1719 = vrot.lane.b32.xlu1 %v3082_v21, %s2755_s25 }
 0x648   : > { %1715 = vrot.lane.b32.xlu0 %v3075_v20, %s2755_s25 }
 0x64b   : > { %1723 = vrot.lane.b32.xlu1 %v3094_v23, %s2755_s25  ;;  %v1485_v23 = vld [vmem:[%s3452_s8 + $0x18] sm:$0xff] }
 0x64c   : > { %1721 = vrot.lane.b32.xlu0 %v3087_v22, %s2755_s25 }
 0x64f   : > { %1727 = vrot.lane.b32.xlu1 %v3102_v25, %s2755_s25  ;;  %v1484_v25 = vld [vmem:[%s3452_s8 + $0x10] sm:$0xff] }
 0x650   : > { %1725 = vrot.lane.b32.xlu0 %v3113_v26, %s2755_s25 }
 0x654   : > { %1729 = vrot.lane.b32.xlu0 %v3131_v27, %s2755_s25  ;;  %s3397_s25 = scalar_lea.hbm %s3454_s10, %s2100_s12 }
 0x6b2   : > { %v1445_v62 = vpop.xlane.xlu0 %1444 }
 0x6b3   : > { %v1459_v0 = vmul.f32 0.041666668, %v1445_v62  ;;  %v1443_v1 = vpop.xlane.xlu1 %1442 }
 0x6b4   : > { %v1458_v63 = vmul.f32 0.041666668, %v1443_v1 }
 0x6b6   : > { %v2472_v2 = vpack.c.bf16 %v1459_v0, %v1458_v63 }
 0x6b7   : > { %v1447_v3 = vpop.xlane.xlu0 %1446  ;;  %v1449_v4 = vpop.xlane.xlu1 %1448 }
 0x6b8   : > { %v1460_v5 = vmul.f32 0.041666668, %v1447_v3  ;;  %v1461_v6 = vmul.f32 0.041666668, %v1449_v4  ;;  %2473 = vmatprep.subr.bf16.mxu0 %v2472_v2  ;;  %v1489_v3 = vld [vmem:[%s3452_s8 + $0x38] sm:$0xff] }
 0x6b9   : > { %2475 = vmatpush3.bf16.msra.mxu0 %v2472_v2 }
 0x6ba   : > { %v2476_v38 = vpack.c.bf16 %v1461_v6, %v1460_v5  ;;  %v1488_v5 = vld [vmem:[%s3452_s8 + $0x30] sm:$0xff] }
 0x6bb   : > { %v1451_v7 = vpop.xlane.xlu0 %1450  ;;  %v1453_v8 = vpop.xlane.xlu1 %1452 }
 0x6bc   : > { %v1462_v10 = vmul.f32 0.041666668, %v1451_v7  ;;  %v1463_v12 = vmul.f32 0.041666668, %v1453_v8  ;;  %2477 = vmatprep.subr.bf16.mxu0 %v2476_v38 }
 0x6bd   : > { %2479 = vmatpush3.bf16.msra.mxu0 %v2476_v38 }
 0x6be   : > { %v2480_v13 = vpack.c.bf16 %v1463_v12, %v1462_v10 }
 0x6bf   : > { %v1455_v14 = vpop.xlane.xlu0 %1454  ;;  %v1457_v16 = vpop.xlane.xlu1 %1456 }
 0x6c0   : > { %v1464_v17 = vmul.f32 0.041666668, %v1455_v14  ;;  %v1465_v28 = vmul.f32 0.041666668, %v1457_v16  ;;  %2481 = vmatprep.subr.bf16.mxu0 %v2480_v13  ;;  %v1490_v16 = vld [vmem:[%s3452_s8 + $0x40] sm:$0xff] }
 0x6c1   : > { %2483 = vmatpush3.bf16.msra.mxu0 %v2480_v13  ;;  %v1491_v13 = vld [vmem:[%s3452_s8 + $0x48] sm:$0xff] }
 0x6c2   : > { %v2484_v29 = vpack.c.bf16 %v1465_v28, %v1464_v17 }
 0x6c4   : > { %2485 = vmatprep.subr.bf16.mxu0 %v2484_v29 }
 0x6c5   : > { %2487 = vmatpush3.bf16.msra.mxu0 %v2484_v29 }
 0x6c8   : > { %2331 = vmatmul.mubr.msk.f32.vlgmr.msra.gmra.mrb[10].mxu0 %vm484_vm0, %v1467_v30 }
 0x6c9   : > { %2333 = vmatprep.mubr.msk.f32.mxu0 %vm484_vm0, %v1468_v31 }
 0x6cc   : > { %2334 = vmatmul.mubr.msk.f32.gmra.mrb[12].mxu0 %vm484_vm0, %v1469_v32 }
 0x6cd   : > { %2336 = vmatprep.mubr.msk.f32.mxu0 %vm484_vm0, %v1470_v33  ;;  %v1493_v33 = vld [vmem:[%s3452_s8 + $0x58] sm:$0xff] }
 0x6d0   : > { %2337 = vmatmul.mubr.msk.f32.gmra.mrb[14].mxu0 %vm484_vm0, %v1471_v34 }
 0x6d1   : > { %2339 = vmatprep.mubr.msk.f32.mxu0 %vm484_vm0, %v1472_v11  ;;  %v1492_v11 = vld [vmem:[%s3452_s8 + $0x50] sm:$0xff] }
 0x6d4   : > { %2340 = vmatmul.mubr.msk.f32.gmra.mrb[16].mxu0 %vm484_vm0, %v1473_v35 }
 0x6d5   : > { %2342 = vmatprep.mubr.msk.f32.mxu0 %vm484_vm0, %v1474_v36 }
 0x6d8   : > { %2343 = vmatmul.mubr.msk.f32.gmra.mrb[18].mxu0 %vm484_vm0, %v1475_v9 }
 0x6d9   : > { %2345 = vmatprep.mubr.msk.f32.mxu0 %vm484_vm0, %v1476_v39 }
 0x6dc   : > { %2346 = vmatmul.mubr.msk.f32.gmra.mrb[20].mxu0 %vm484_vm0, %v1477_v40 }
 0x6dd   : > { %2348 = vmatprep.mubr.msk.f32.mxu0 %vm484_vm0, %v1478_v41 }
 0x6e0   : > { %2349 = vmatmul.mubr.msk.f32.gmra.mrb[22].mxu0 %vm484_vm0, %v1479_v42  ;;  %v1495_v42 = vld [vmem:[%s3452_s8 + $0x68] sm:$0xff] }
 0x6e1   : > { %2351 = vmatprep.mubr.msk.f32.mxu0 %vm484_vm0, %v1480_v43 }
 0x6e4   : > { %2352 = vmatmul.mubr.msk.f32.gmra.mrb[24].mxu0 %vm484_vm0, %v1481_v44  ;;  %v1494_v44 = vld [vmem:[%s3452_s8 + $0x60] sm:$0xff] }
 0x6e5   : > { %2386 = vmatprep.mubr.f32.mxu0 %v1707_v45 }
 0x79b   : > { %v2332_v20 = vpop.f32.mrb[10].mxu0 }
 0x79c   : > { %v1618_v22 = vadd.f32 %v2332_v20, %v1483_v48  ;;  %v1612_v49 = vpop.f32.mrb[11].mxu0 }
 0x79d   : > { %v1613_v21 = vadd.f32 %v1612_v49, %v1482_v19  ;;  %v1497_v49 = vld [vmem:[%s3452_s8 + $0x78] sm:$0xff] }
 0x79e   : > { %v1692_v26 = vmax.f32 %v1618_v22, 0.0 }
 0x79f   : > { %v1691_v27 = vmax.f32 %v1613_v21, 0.0  ;;  %v2335_v50 = vpop.f32.mrb[12].mxu0 }
 0x7a0   : > { %v1628_v52 = vadd.f32 %v2335_v50, %v1485_v23  ;;  %v1622_v53 = vpop.f32.mrb[13].mxu0  ;;  %v1496_v23 = vld [vmem:[%s3452_s8 + $0x70] sm:$0xff] }
 0x7a1   : > { %v2488_v54 = vpack.c.bf16 %v1692_v26, %v1691_v27  ;;  %v1623_v55 = vadd.f32 %v1622_v53, %v1484_v25 }
 0x7a2   : > { %v1694_v59 = vmax.f32 %v1628_v52, 0.0 }
 0x7a3   : > { %v1693_v61 = vmax.f32 %v1623_v55, 0.0  ;;  %v2338_v62 = vpop.f32.mrb[14].mxu0  ;;  %2489 = vmatprep.subr.bf16.mxu0 %v2488_v54  ;;  %2520 = vmatprep.subr.bf16.mxu1 %v2488_v54 }
 0x7a4   : > { %v1638_v0 = vadd.f32 %v2338_v62, %v1487_v56  ;;  %v1632_v1 = vpop.f32.mrb[15].mxu0  ;;  %2491 = vmatpush3.bf16.msra.mxu0 %v2488_v54  ;;  %2528 = vmatpush3.bf16.msra.mxu1 %v2488_v54  ;;  %v1712_v62 = vld [vmem:[%s3453_s9 + $0x28] sm:$0xff] }
 0x7a5   : > { %v2492_v63 = vpack.c.bf16 %v1694_v59, %v1693_v61  ;;  %v1633_v2 = vadd.f32 %v1632_v1, %v1486_v60  ;;  %v1708_v59 = vld [vmem:[%s3453_s9 + $0x8] sm:$0xff]  ;;  %v1710_v60 = vld [vmem:[%s3453_s9 + $0x18] sm:$0xff]  ;;  %v1711_v61 = vld [vmem:[%s3453_s9 + $0x20] sm:$0xff] }
 0x7a6   : > { %v1696_v4 = vmax.f32 %v1638_v0, 0.0  ;;  %v1713_v0 = vld [vmem:[%s3453_s9 + $0x30] sm:$0xff]  ;;  %v1714_v1 = vld [vmem:[%s3453_s9 + $0x38] sm:$0xff] }
 0x7a7   : > { %v1695_v6 = vmax.f32 %v1633_v2, 0.0  ;;  %v2341_v38 = vpop.f32.mrb[16].mxu0  ;;  %2493 = vmatprep.subr.bf16.mxu0 %v2492_v63  ;;  %2521 = vmatprep.subr.bf16.mxu1 %v2492_v63  ;;  %v1716_v2 = vpop.permute.xlu0 %1715 }
 0x7a8   : > { %v1648_v7 = vadd.f32 %v2341_v38, %v1489_v3  ;;  %v1642_v8 = vpop.f32.mrb[17].mxu0  ;;  %2495 = vmatpush3.bf16.msra.mxu0 %v2492_v63  ;;  %2529 = vmatpush3.bf16.msra.mxu1 %v2492_v63  ;;  %v1718_v63 = vpop.permute.xlu1 %1717 }
 0x7a9   : > { %v2496_v10 = vpack.c.bf16 %v1696_v4, %v1695_v6  ;;  %v1643_v12 = vadd.f32 %v1642_v8, %v1488_v5 }
 0x7aa   : > { %v1698_v14 = vmax.f32 %v1648_v7, 0.0 }
 0x7ab   : > { %v1697_v17 = vmax.f32 %v1643_v12, 0.0  ;;  %v2344_v28 = vpop.f32.mrb[18].mxu0  ;;  %2497 = vmatprep.subr.bf16.mxu0 %v2496_v10  ;;  %2522 = vmatprep.subr.bf16.mxu1 %v2496_v10  ;;  %v1722_v4 = vpop.permute.xlu0 %1721 }
 0x7ac   : > { %v1658_v29 = vadd.f32 %v2344_v28, %v1491_v13  ;;  %v1652_v30 = vpop.f32.mrb[19].mxu0  ;;  %2499 = vmatpush3.bf16.msra.mxu0 %v2496_v10  ;;  %2530 = vmatpush3.bf16.msra.mxu1 %v2496_v10  ;;  %v1720_v3 = vpop.permute.xlu1 %1719 }
 0x7ad   : > { %v2500_v31 = vpack.c.bf16 %v1698_v14, %v1697_v17  ;;  %v1653_v32 = vadd.f32 %v1652_v30, %v1490_v16 }
 0x7ae   : > { %v1700_v34 = vmax.f32 %v1658_v29, 0.0 }
 0x7af   : > { %v1699_v35 = vmax.f32 %v1653_v32, 0.0  ;;  %v2347_v36 = vpop.f32.mrb[20].mxu0  ;;  %2501 = vmatprep.subr.bf16.mxu0 %v2500_v31  ;;  %2523 = vmatprep.subr.bf16.mxu1 %v2500_v31  ;;  %v1726_v6 = vpop.permute.xlu0 %1725 }
 0x7b0   : > { %v1668_v9 = vadd.f32 %v2347_v36, %v1493_v33  ;;  %v1662_v39 = vpop.f32.mrb[21].mxu0  ;;  %2503 = vmatpush3.bf16.msra.mxu0 %v2500_v31  ;;  %2531 = vmatpush3.bf16.msra.mxu1 %v2500_v31  ;;  %v1724_v5 = vpop.permute.xlu1 %1723 }
 0x7b1   : > { %v2504_v40 = vpack.c.bf16 %v1700_v34, %v1699_v35  ;;  %v1663_v41 = vadd.f32 %v1662_v39, %v1492_v11 }
 0x7b2   : > { %v1702_v43 = vmax.f32 %v1668_v9, 0.0 }
 0x7b3   : > { %v1701_v45 = vmax.f32 %v1663_v41, 0.0  ;;  %v2350_v46 = vpop.f32.mrb[22].mxu0  ;;  %2505 = vmatprep.subr.bf16.mxu0 %v2504_v40  ;;  %2524 = vmatprep.subr.bf16.mxu1 %v2504_v40  ;;  %v1730_v9 = vpop.permute.xlu0 %1729 }
 0x7b4   : > { %v1678_v48 = vadd.f32 %v2350_v46, %v1495_v42  ;;  %v1672_v19 = vpop.f32.mrb[23].mxu0  ;;  %2507 = vmatpush3.bf16.msra.mxu0 %v2504_v40  ;;  %2532 = vmatpush3.bf16.msra.mxu1 %v2504_v40  ;;  %v1728_v40 = vpop.permute.xlu1 %1727 }
 0x7b5   : > { %v2508_v20 = vpack.c.bf16 %v1702_v43, %v1701_v45  ;;  %v1673_v22 = vadd.f32 %v1672_v19, %v1494_v44 }
 0x7b6   : > { %v1704_v21 = vmax.f32 %v1678_v48, 0.0 }
 0x7b7   : > { %v1703_v26 = vmax.f32 %v1673_v22, 0.0  ;;  %v2353_v25 = vpop.f32.mrb[24].mxu0  ;;  %2509 = vmatprep.subr.bf16.mxu0 %v2508_v20  ;;  %2525 = vmatprep.subr.bf16.mxu1 %v2508_v20 }
 0x7b8   : > { %v1688_v27 = vadd.f32 %v2353_v25, %v1497_v49  ;;  %v1682_v50 = vpop.f32.mrb[25].mxu0  ;;  %2511 = vmatpush3.bf16.msra.mxu0 %v2508_v20  ;;  %2533 = vmatpush3.bf16.msra.mxu1 %v2508_v20 }
 0x7b9   : > { %v2512_v52 = vpack.c.bf16 %v1704_v21, %v1703_v26  ;;  %v1683_v53 = vadd.f32 %v1682_v50, %v1496_v23 }
 0x7ba   : > { %v1706_v54 = vmax.f32 %v1688_v27, 0.0 }
 0x7bb   : > { %v1705_v55 = vmax.f32 %v1683_v53, 0.0  ;;  %2513 = vmatprep.subr.bf16.mxu0 %v2512_v52  ;;  %2526 = vmatprep.subr.bf16.mxu1 %v2512_v52 }
 0x7bc   : > { %2515 = vmatpush3.bf16.msra.mxu0 %v2512_v52  ;;  %2534 = vmatpush3.bf16.msra.mxu1 %v2512_v52 }
 0x7bd   : > { %v2516_v56 = vpack.c.bf16 %v1706_v54, %v1705_v55 }
 0x7bf   : > { %2517 = vmatprep.subr.bf16.mxu0 %v2516_v56  ;;  %2527 = vmatprep.subr.bf16.mxu1 %v2516_v56 }
 0x7c0   : > { %2519 = vmatpush3.bf16.msra.mxu0 %v2516_v56  ;;  %2535 = vmatpush3.bf16.msra.mxu1 %v2516_v56 }
 0x7c3   : > { %2387 = vmatmul.mubr.f32.vlgmr.msra.gmra.mrb[26].mxu0 %v1708_v59  ;;  %2390 = vmatmul.mubr.f32.vlgmr.msra.gmra.mrb[12].mxu1 %v1710_v60 }
 0x7c4   : > { %2392 = vmatprep.mubr.f32.mxu1 %v1711_v61 }
 0x7c7   : > { %2393 = vmatmul.mubr.f32.gmra.mrb[14].mxu1 %v1712_v62 }
 0x7c8   : > { %2395 = vmatprep.mubr.f32.mxu1 %v1713_v0 }
 0x7cb   : > { %2396 = vmatmul.mubr.f32.gmra.mrb[16].mxu1 %v1714_v1 }
 0x896   : > { %v2388_v38 = vpop.f32.mrb[26].mxu0  ;;  %v2391_v7 = vpop.f32.mrb[12].mxu1 }
 0x897   : > { %v1811_v8 = vadd.f32 %v2388_v38, %v1718_v63  ;;  %v1821_v10 = vadd.f32 %v2391_v7, %v1722_v4  ;;  %v1805_v12 = vpop.f32.mrb[27].mxu0  ;;  %v1815_v13 = vpop.f32.mrb[13].mxu1 }
 0x898   : > { %v1806_v14 = vadd.f32 %v1805_v12, %v1716_v2  ;;  %v1816_v16 = vadd.f32 %v1815_v13, %v1720_v3  ;;  %v1943_v13 = vld [vmem:[%s2889_s29 + $0x18] sm:$0xff] }
 0x899   : > { %v1845_v17 = vsub.f32 0.0, %v1811_v8  ;;  %v1847_v28 = vsub.f32 0.0, %v1821_v10  ;;  %v1941_v8 = vld [vmem:[%s2889_s29 + $0x8] sm:$0xff] }
 0x89a   : > { %v1844_v29 = vsub.f32 0.0, %v1806_v14  ;;  %v1846_v30 = vsub.f32 0.0, %v1816_v16  ;;  %v2394_v31 = vpop.f32.mrb[14].mxu1 }
 0x89b   : > { %v1854_v32 = vmul.f32 1.442695, %v1845_v17  ;;  %v1858_v33 = vmul.f32 1.442695, %v1847_v28  ;;  %v1825_v34 = vpop.f32.mrb[15].mxu1  ;;  %v1831_v11 = vadd.f32 %v2394_v31, %v1726_v6  ;;  %v1944_v31 = vld [vmem:[%s2889_s29 + $0x20] sm:$0xff] }
 0x89c   : > { %v1852_v35 = vmul.f32 1.442695, %v1844_v29  ;;  %v1826_v36 = vadd.f32 %v1825_v34, %v1724_v5  ;;  %v1856_v39 = vmul.f32 1.442695, %v1846_v30  ;;  %v1940_v29 = vld [vmem:[%s2889_s29] sm:$0xff] }
 0x89d   : > { %2654 = vpow2.f32 %v1854_v32  ;;  %v1849_v41 = vsub.f32 0.0, %v1831_v11  ;;  %v1942_v11 = vld [vmem:[%s2889_s29 + $0x10] sm:$0xff] }
 0x89e   : > { %2656 = vpow2.f32 %v1858_v33  ;;  %v1848_v42 = vsub.f32 0.0, %v1826_v36  ;;  %v2397_v43 = vpop.f32.mrb[16].mxu1  ;;  %v1946_v36 = vld [vmem:[%s2889_s29 + $0x30] sm:$0xff] }
 0x89f   : > { %2658 = vpow2.f32 %v1852_v35  ;;  %v1835_v44 = vpop.f32.mrb[17].mxu1  ;;  %v1841_v45 = vadd.f32 %v2397_v43, %v1730_v9  ;;  %v1862_v19 = vmul.f32 1.442695, %v1849_v41 }
 0x8a0   : > { %v1860_v46 = vmul.f32 1.442695, %v1848_v42  ;;  %v1836_v48 = vadd.f32 %v1835_v44, %v1728_v40  ;;  %2660 = vpow2.f32 %v1856_v39 }
 0x8a1   : > { %v1851_v20 = vsub.f32 0.0, %v1841_v45  ;;  %v1947_v45 = vld [vmem:[%s2889_s29 + $0x38] sm:$0xff] }
 0x8a2   : > { %2662 = vpow2.f32 %v1860_v46  ;;  %v1850_v22 = vsub.f32 0.0, %v1836_v48 }
 0x8a3   : > { %2664 = vpow2.f32 %v1862_v19  ;;  %v1866_v21 = vmul.f32 1.442695, %v1851_v20 }
 0x8a4   : > { %v1864_v49 = vmul.f32 1.442695, %v1850_v22 }
 0x8a6   : > { %2666 = vpow2.f32 %v1864_v49 }
 0x8a7   : > { %v2655_v23 = vpop.eup %2654  ;;  %2668 = vpow2.f32 %v1866_v21 }
 0x8a8   : > { %v2657_v26 = vpop.eup %2656  ;;  %v1869_v25 = vadd.f32 1.0, %v2655_v23 }
 0x8a9   : > { %v2659_v27 = vpop.eup %2658  ;;  %v1871_v50 = vadd.f32 1.0, %v2657_v26 }
 0x8aa   : > { %2670 = vrcp.f32 %v1869_v25  ;;  %v1868_v52 = vadd.f32 1.0, %v2659_v27  ;;  %v2661_v53 = vpop.eup %2660 }
 0x8ab   : > { %2672 = vrcp.f32 %v1871_v50  ;;  %v1870_v59 = vadd.f32 1.0, %v2661_v53 }
 0x8ac   : > { %v2663_v54 = vpop.eup %2662  ;;  %2674 = vrcp.f32 %v1868_v52 }
 0x8ad   : > { %v1872_v55 = vadd.f32 1.0, %v2663_v54  ;;  %v2665_v56 = vpop.eup %2664 }
 0x8ae   : > { %v1873_v62 = vadd.f32 1.0, %v2665_v56 }
 0x8af   : > { %2676 = vrcp.f32 %v1872_v55 }
 0x8b0   : > { %v2667_v60 = vpop.eup %2666  ;;  %2678 = vrcp.f32 %v1870_v59 }
 0x8b1   : > { %v1874_v61 = vadd.f32 1.0, %v2667_v60  ;;  %v2669_v0 = vpop.eup %2668 }
 0x8b2   : > { %v1875_v2 = vadd.f32 1.0, %v2669_v0 }
 0x8b3   : > { %2680 = vrcp.f32 %v1874_v61 }
 0x8b4   : > { %v2671_v1 = vpop.eup %2670  ;;  %2682 = vrcp.f32 %v1873_v62 }
 0x8b5   : > { %v2673_v63 = vpop.eup %2672  ;;  %1899 = vperm.xlu0 %2652, %v2671_v1   ;;  %2684 = vrcp.f32 %v1875_v2 }
 0x8b6   : > { %1909 = vperm.xlu1 %2653, %v2673_v63   ;;  %v2675_v3 = vpop.eup %2674 }
 0x8b9   : > { %v2677_v4 = vpop.eup %2676 }
 0x8ba   : > { %1894 = vperm.xlu1 %2653, %v2675_v3   ;;  %1914 = vperm.xlu0 %2652, %v2677_v4   ;;  %v2679_v5 = vpop.eup %2678 }
 0x8bd   : > { %v2681_v6 = vpop.eup %2680 }
 0x8be   : > { %1904 = vperm.xlu1 %2653, %v2679_v5   ;;  %1924 = vperm.xlu0 %2652, %v2681_v6   ;;  %v2683_v38 = vpop.eup %2682 }
 0x8bf   : > { %v2685_v7 = vpop.eup %2684 }
 0x8c2   : > { %1919 = vperm.xlu1 %2653, %v2683_v38  }
 0x8c6   : > { %1929 = vperm.xlu1 %2653, %v2685_v7  }
 0x934   : > { %v1900_v10 = vpop.permute.xlu0 %1899 }
 0x935   : > { %v1933_v12 = vmul.f32 %v1900_v10, %v3179_v15  ;;  %v1910_v14 = vpop.permute.xlu1 %1909 }
 0x936   : > { %v1935_v16 = vmul.f32 %v1910_v14, %v3189_v24 }
 0x937   : > { %v1949_v17 = vadd.f32 %v1941_v8, %v1933_v12 }
 0x938   : > { %v1951_v28 = vadd.f32 %v1943_v13, %v1935_v16 }
 0x939   : > { %1957 = vst [vmem:[%s3368_s11 + $0x8] sm:$0xff] %v1949_v17  ;;  %v1895_v30 = vpop.permute.xlu1 %1894  ;;  %v1915_v32 = vpop.permute.xlu0 %1914 }
 0x93a   : > { %1959 = vst [vmem:[%s3368_s11 + $0x18] sm:$0xff] %v1951_v28  ;;  %v1932_v15 = vmul.f32 %v1895_v30, %v3181_v18  ;;  %v1936_v24 = vmul.f32 %v1915_v32, %v3201_v51  ;;  %v1945_v51 = vld [vmem:[%s2889_s29 + $0x28] sm:$0xff]  ;;  %s2686_s29 = scalar_lea.vmem %s3390_s21, 1024 }
 0x93b   : > { %p2687_p13 = scmp.ne.s32.totalorder %s3390_s21, %s2686_s29  ;;  %p2694_p3 = scmp.lt.s32.totalorder %s2692_s17, %s2686_s29 }
 0x93c   : > { %v1948_v33 = vadd.f32 %v1940_v29, %v1932_v15  ;;  %v1952_v34 = vadd.f32 %v1944_v31, %v1936_v24 }
 0x93d   : > { %v1905_v35 = vpop.permute.xlu1 %1904  ;;  %v1925_v9 = vpop.permute.xlu0 %1924  ;;  %p2688_p0 = pnand %p2687_p13, %p2853_p6  ;;  %p2695_p4 = por %p2694_p3, %p2693_p2 }
 0x93e   : > { %1956 = vst [vmem:[%s3368_s11] sm:$0xff] %v1948_v33  ;;  %1960 = vst [vmem:[%s3368_s11 + $0x20] sm:$0xff] %v1952_v34  ;;  %v1934_v39 = vmul.f32 %v1905_v35, %v3191_v37  ;;  %v1938_v18 = vmul.f32 %v1925_v9, %v3211_v58 }
 0x93f   : > { %p2689_p1 = pneg %p2688_p0 }
 0x940   : > { %v1950_v40 = vadd.f32 %v1942_v11, %v1934_v39  ;;  %v1954_v41 = vadd.f32 %v1946_v36, %v1938_v18 }
 0x941   : > { %v1920_v42 = vpop.permute.xlu1 %1919  ;;  %p2696_p5 = pnand %p2695_p4, %p2689_p1 }
 0x942   : > { %1958 = vst [vmem:[%s3368_s11 + $0x10] sm:$0xff] %v1950_v40  ;;  %1962 = vst [vmem:[%s3368_s11 + $0x30] sm:$0xff] %v1954_v41  ;;  %v1937_v43 = vmul.f32 %v1920_v42, %v3199_v47 }
 0x944   : > { %v1953_v44 = vadd.f32 %v1945_v51, %v1937_v43 }
 0x945   : > { %v1930_v46 = vpop.permute.xlu1 %1929 }
 0x946   : > { %1961 = vst [vmem:[%s3368_s11 + $0x28] sm:$0xff] %v1953_v44  ;;  %v1939_v37 = vmul.f32 %v1930_v46, %v3209_v57 }
 0x948   : > { %v1955_v47 = vadd.f32 %v1947_v45, %v1939_v37 }
 0x94a   : > { %1963 = vst [vmem:[%s3368_s11 + $0x38] sm:$0xff] %v1955_v47 }
 0x94b   : > { %2699 = shalt.err (!%p2696_p5)
}
 0x94c   : > { %s2700_s11 = scalar_lea.hbm %s3397_s25, 1024  ;;  %s2704_s20 = scalar_lea.hbm %s3454_s10, 2048 }
 0x94d   : > { %p2701_p7 = scmp.ne.s32.totalorder %s3397_s25, %s2700_s11  ;;  %p2705_p12 = scmp.lt.u32.totalorder %s3397_s25, %s3454_s10 }
 0x94e   : > { %p2706_p13 = scmp.lt.u32.totalorder %s2704_s20, %s2700_s11  ;;  %p2708_p1 = scmp.lt.u32.totalorder %s2700_s11, %s3397_s25 }
 0x94f   : > { %p2702_p10 = pnand %p2701_p7, %p2853_p6 }
 0x950   : > { %p2707_p0 = por %p2706_p13, %p2705_p12 }
 0x951   : > { %p2703_p11 = pneg %p2702_p10 }
 0x952   : > { %p2709_p2 = por %p2708_p1, %p2707_p0 }
 0x954   : > { %p2710_p3 = pnand %p2709_p2, %p2703_p11 }
 0x956   : > { %2713 = shalt.err (!%p2710_p3)
}
 0x957   : > { %s2757_s29 = smov 128   ;;  %s2758_s30 = smov 256  }
 0x958   : > { %s2759_s17 = smov 8  }
 0x959   : > { %2536 = dma.vmem_to_hbm [thread:$0]  (%p2853_p6), %s3390_s21, 1024, %s3397_s25, %s3402_s27, %s2757_s29, %s2758_s30, %s2759_s17  }
 0x95a PF: > { %s1992_s12 = sand.u32 1, %s2736_s13   ;;  %p2539_p4 = pnand %p2047_p9, %p2857_p8 }
 0x95b   : > { %s1993_s11 = scalar_lea.sflag [#allocation6], %s1992_s12 }
 0x95c   : > { %2731 = dma.done.wait (!%p2539_p4), %s1993_s11, 1024  }
 0x95d   : > { %2733 = vsyncadd (!%p2539_p4), %s1993_s11, 4294966272  ;;  %p20_p5 = scmp.ge.s32.totalorder %s2838_s19, 4   ;;  %s3467_s13 = smov %s2740_s14 }
 0x95e   : > { %s3468_s14 = smov %s2744_s15  ;;  %s3469_s15 = smov %s2851_s22 }
 0x95f   : > { %s3470_s16 = smov %s2838_s19  ;;  %22 = sbr.rel (!%p20_p5) target bundleno = 3 (0x3), region = 142 }
 0x966   :  { %1998 = vsyncpa [#allocation6], 1 }
 0x967   :  { %2000 = vsyncpa [#allocation6 + $0x1], 1 }

</bundles_post_ra>
